<compile_context>
chip_gen: v5e
topology: v5e:2x2
jax: 0.10.0
libtpu: 0.0.40
codegen_flags: <defaults>
</compile_context>

<pallas_src>
import functools

import jax
import jax.numpy as jnp
from jax.experimental import pallas as pl
from jax.experimental.pallas import tpu as pltpu


def _vmem_capacity_bytes():
    """Physical per-core VMEM; conservative (v7x = 64 MiB) fallback if query fails."""
    try:
        cap = getattr(pltpu.get_tpu_info(), "vmem_capacity_bytes", None)
        if cap:
            return int(cap)
    except Exception:
        pass
    return 64 * 1024 * 1024


def _row_tile(rows, d):
    """Row tile: target ~1-2 MiB of f32 x per tile; >= 2 row tiles when cheap."""
    cand = 2048 if d <= 256 else 1024 if d <= 512 else 512 if d <= 1024 else 256
    if rows <= cand:
        if rows >= 16 and rows % 8 == 0 and (rows // 2) % 8 == 0:
            return rows // 2  # two row tiles -> both v7x TensorCores get work
        return rows           # single full-extent block (always layout-legal)
    return cand


def _col_tile(d, weight_resident_budget_bytes):
    """Output-column tile of the folded weight."""
    if d * d * 2 <= weight_resident_budget_bytes:
        return d  # whole bf16 weight resident; constant block index -> streamed once
    for tn in (512, 256, 128):
        if d % tn == 0:
            return tn
    # D > 128 and not a multiple of 128: non-lane-dense (masked) stores; still correct.
    return d


def _vmem_needed_bytes(tr, tn, d, out_itemsize):
    col_blocked = tn != d
    x_bytes = 2 * tr * d * 4                       # x row tile, f32, double-buffered
    w_bytes = 2 * d * tn * 2                       # folded weight, bf16
    b_bytes = 2 * max(tn, 128) * 4                 # folded bias
    xres_bytes = (2 * tr * tn * 4) if col_blocked else 0   # residual view of x
    o_bytes = 2 * tr * tn * out_itemsize           # output tile
    s_bytes = tr * d * 2                           # cached LayerNorm output (bf16)
    return x_bytes + w_bytes + b_bytes + xres_bytes + o_bytes + s_bytes


def _sublayer_connection_kernel(*refs, eps, n_col_blocks):
    """Fused: out = x + (LayerNorm(x) @ W' + b').

    refs (n_col_blocks == 1): x(TR,D), W'(D,TN), b'(1,TN), out(TR,TN), normed(TR,D)
    refs (n_col_blocks  > 1): x(TR,D), W'(D,TN), b'(1,TN), x_res(TR,TN), out, normed
    """
    if n_col_blocks == 1:
        x_ref, w_ref, b_ref, o_ref, normed_ref = refs
        xres_ref = x_ref  # full feature dim == this output tile
    else:
        x_ref, w_ref, b_ref, xres_ref, o_ref, normed_ref = refs

    # LayerNorm once per row tile; column blocks j > 0 reuse the bf16 cache.
    @pl.when(pl.program_id(1) == 0)
    def _():
        x = x_ref[...].astype(jnp.float32)
        d = x.shape[-1]
        # One-pass statistics. PyTorch-module semantics: unbiased std, eps on std.
        s1 = jnp.sum(x, axis=-1, keepdims=True)
        s2 = jnp.sum(x * x, axis=-1, keepdims=True)
        mean = s1 * (1.0 / d)
        var = jnp.maximum((s2 - d * mean * mean) * (1.0 / (d - 1)), 0.0)
        inv_std = pl.reciprocal(jnp.sqrt(var) + eps, approx=True)  # EUP slot
        normed_ref[...] = ((x - mean) * inv_std).astype(jnp.bfloat16)

    # bf16 MXU matmul with f32 accumulation, folded bias add.
    y = jnp.dot(normed_ref[...], w_ref[...], preferred_element_type=jnp.float32)
    y = y + b_ref[...]

    # Residual add (dropout in eval / p=0 is identity).
    o_ref[...] = (xres_ref[...].astype(jnp.float32) + y).astype(o_ref.dtype)


def sublayer_connection(x, a_2, b_2, w, wb, *, eps=1e-6, tile_rows=None,
                        weight_resident_budget_bytes=None):
    """x: [B, S, D] float32. Params: a_2, b_2, wb: [D]; w: [D, D]."""
    B, S, D = x.shape
    assert D >= 2, "feature dim must be >= 2 (unbiased std divides by D-1)"
    rows = B * S

    vmem_cap = _vmem_capacity_bytes()
    vmem_budget = int(0.8 * vmem_cap)  # headroom for Mosaic internal scratch/semaphores
    if weight_resident_budget_bytes is None:
        # Keep the whole folded weight resident when small relative to this
        # generation's VMEM (D <= ~2048 on v5e/v6e, ~1448 on v7x).
        weight_resident_budget_bytes = (8 << 20) if vmem_cap >= (100 << 20) else (4 << 20)

    # Fold LN affine + linear bias into the weight/bias (one-time host cost):
    #   (a*(x-mean)/(std+eps) + b) @ W + wb
    #     == ((x-mean)/(std+eps)) @ (a[:,None]*W) + (b @ W + wb)
    w_folded = (a_2[:, None] * w).astype(jnp.bfloat16)
    b_folded = (b_2 @ w + wb).reshape(1, D).astype(jnp.float32)

    x2 = x.reshape(rows, D)
    out_itemsize = jnp.dtype(x.dtype).itemsize

    if tile_rows is not None:
        assert tile_rows == rows or tile_rows % 8 == 0
        tr = min(tile_rows, rows)
    else:
        tr = _row_tile(rows, D)
    tn = _col_tile(D, weight_resident_budget_bytes)

    # Shrink tiles if the double-buffered footprint would not fit VMEM
    # (matters on v7x's 64 MiB for very large D).
    while _vmem_needed_bytes(tr, tn, D, out_itemsize) + (4 << 20) > vmem_budget:
        if tn >= 256 and tn % 256 == 0 and D % (tn // 2) == 0:
            tn //= 2
        elif tr >= 16 and tr % 16 == 0:
            tr //= 2
        else:
            break

    n_row_blocks = pl.cdiv(rows, tr)   # non-divisible tail handled by masked stores
    n_col_blocks = D // tn
    grid = (n_row_blocks, n_col_blocks)

    vmem_limit = int(min(max(_vmem_needed_bytes(tr, tn, D, out_itemsize) + (4 << 20),
                             32 << 20), vmem_budget))

    in_specs = [
        pl.BlockSpec((tr, D), lambda i, j: (i, 0)),   # x row tile (full D, resident over j)
        pl.BlockSpec((D, tn), lambda i, j: (0, j)),   # folded weight (bf16)
        pl.BlockSpec((1, tn), lambda i, j: (0, j)),   # folded bias (f32)
    ]
    operands = [x2, w_folded, b_folded]
    if n_col_blocks > 1:
        # Column-blocked view of x for the residual add (avoids a dynamic
        # lane-dim slice of the row tile).
        in_specs.append(pl.BlockSpec((tr, tn), lambda i, j: (i, j)))
        operands.append(x2)

    kernel = functools.partial(_sublayer_connection_kernel, eps=eps,
                               n_col_blocks=n_col_blocks)

    out = pl.pallas_call(
        kernel,
        out_shape=jax.ShapeDtypeStruct((rows, D), x.dtype),
        grid_spec=pltpu.PrefetchScalarGridSpec(
            num_scalar_prefetch=0,
            grid=grid,
            in_specs=in_specs,
            out_specs=pl.BlockSpec((tr, tn), lambda i, j: (i, j)),
            scratch_shapes=[pltpu.VMEM((tr, D), jnp.bfloat16)],  # cached LayerNorm(x)
        ),
        compiler_params=pltpu.CompilerParams(
            dimension_semantics=("parallel", "arbitrary"),
            vmem_limit_bytes=vmem_limit,
        ),
    )(*operands)

    return out.reshape(B, S, D)


def _reference(x, a_2, b_2, w, wb, eps=1e-6):
    """Pure-JAX f32 reference mirroring the PyTorch module."""
    d = x.shape[-1]
    mean = jnp.mean(x, axis=-1, keepdims=True)
    centered = x - mean
    std = jnp.sqrt(jnp.sum(centered**2, axis=-1, keepdims=True) / (d - 1))
    normed = a_2 * centered / (std + eps) + b_2
    return x + (normed @ w + wb)


if __name__ == "__main__":
    key = jax.random.PRNGKey(0)

    def run_case(B, S, D, case_key, atol=2e-2, rtol=2e-2, **kwargs):
        kx, kw, kb, ka, kb2 = jax.random.split(case_key, 5)
        x = jax.random.normal(kx, (B, S, D), dtype=jnp.float32)
        # Non-trivial LN affine so the host-side folding is actually exercised.
        a_2 = 1.0 + 0.1 * jax.random.normal(ka, (D,), dtype=jnp.float32)
        b_2 = 0.1 * jax.random.normal(kb2, (D,), dtype=jnp.float32)
        w = jax.random.normal(kw, (D, D), dtype=jnp.float32) * 0.05
        wb = jax.random.normal(kb, (D,), dtype=jnp.float32) * 0.05

        out = jax.block_until_ready(sublayer_connection(x, a_2, b_2, w, wb, **kwargs))
        ref = _reference(x, a_2, b_2, w, wb)
        assert out.shape == (B, S, D)
        # bf16 matmul + approx reciprocal -> loosened tolerance vs f32 reference.
        assert jnp.allclose(out, ref, atol=atol, rtol=rtol), \
            f"mismatch at {(B, S, D, kwargs)}"

    # Lane-dense D, two row tiles, weight fully resident (single column block).
    run_case(4, 128, 128, jax.random.fold_in(key, 0))
    # Original tiny shape (D < 128 path).
    run_case(2, 8, 32, jax.random.fold_in(key, 1))
    # Ragged rows: full-extent row block, no host-side pad / slice.
    run_case(2, 5, 128, jax.random.fold_in(key, 2))
    # Ragged rows with a partial tail block (Pallas-masked tail stores).
    run_case(2, 5, 128, jax.random.fold_in(key, 3), tile_rows=8)
    # Force column tiling to exercise the cached-LayerNorm scratch-reuse path
    # and the column-blocked residual view (larger D -> slightly looser atol).
    run_case(2, 64, 1024, jax.random.fold_in(key, 4), atol=5e-2,
             weight_resident_budget_bytes=1)

    print("KERNEL_OK")
</pallas_src>

<mosaic_0001>
module attributes {stable_mosaic.version = 11 : i64} {
  func.func @_sublayer_connection_kernel(%arg0: i32, %arg1: i32, %arg2: memref<256x128xf32, #tpu.memory_space<vmem>>, %arg3: memref<128x128xbf16, #tpu.memory_space<vmem>>, %arg4: memref<1x128xf32, #tpu.memory_space<vmem>>, %arg5: memref<256x128xf32, #tpu.memory_space<vmem>>, %arg6: memref<256x128xbf16, #tpu.memory_space<vmem>>) attributes {dimension_semantics = [#tpu.dimension_semantics<parallel>, #tpu.dimension_semantics<arbitrary>], iteration_bounds = array<i64: 2, 1>, scalar_prefetch = 0 : i64, scratch_operands = 1 : i64, tpu.core_type = #tpu.core_type<tc>, window_params = [{transform_indices = @transform_0, window_bounds = array<i64: 256, 128>}, {transform_indices = @transform_1, window_bounds = array<i64: 128, 128>}, {transform_indices = @transform_2, window_bounds = array<i64: 1, 128>}, {transform_indices = @transform_3, window_bounds = array<i64: 256, 128>}]} {
    %c0_i32 = arith.constant 0 : i32
    %0 = arith.cmpi eq, %arg1, %c0_i32 : i32
    %1 = arith.extui %0 : i1 to i32
    %c0_i32_0 = arith.constant 0 : i32
    %2 = arith.cmpi ne, %1, %c0_i32_0 : i32
    scf.if %2 {
      %c0_10 = arith.constant 0 : index
      %c0_11 = arith.constant 0 : index
      %12 = vector.load %arg2[%c0_10, %c0_11] : memref<256x128xf32, #tpu.memory_space<vmem>>, vector<256x128xf32>
      %cst_12 = arith.constant dense<0.000000e+00> : vector<256xf32>
      %13 = vector.multi_reduction <add>, %12, %cst_12 [1] : vector<256x128xf32> to vector<256xf32>
      %14 = vector.shape_cast %13 : vector<256xf32> to vector<256x1xf32>
      %15 = arith.mulf %12, %12 : vector<256x128xf32>
      %cst_13 = arith.constant dense<0.000000e+00> : vector<256xf32>
      %16 = vector.multi_reduction <add>, %15, %cst_13 [1] : vector<256x128xf32> to vector<256xf32>
      %17 = vector.shape_cast %16 : vector<256xf32> to vector<256x1xf32>
      %cst_14 = arith.constant 7.812500e-03 : f32
      %18 = vector.broadcast %cst_14 : f32 to vector<256x1xf32>
      %19 = arith.mulf %14, %18 : vector<256x1xf32>
      %cst_15 = arith.constant 1.280000e+02 : f32
      %20 = vector.broadcast %cst_15 : f32 to vector<256x1xf32>
      %21 = arith.mulf %20, %19 : vector<256x1xf32>
      %22 = arith.mulf %21, %19 : vector<256x1xf32>
      %23 = arith.subf %17, %22 : vector<256x1xf32>
      %cst_16 = arith.constant 0.00787401571 : f32
      %24 = vector.broadcast %cst_16 : f32 to vector<256x1xf32>
      %25 = arith.mulf %23, %24 : vector<256x1xf32>
      %cst_17 = arith.constant 0.000000e+00 : f32
      %26 = vector.broadcast %cst_17 : f32 to vector<256x1xf32>
      %27 = arith.maximumf %25, %26 : vector<256x1xf32>
      %28 = math.sqrt %27 : vector<256x1xf32>
      %cst_18 = arith.constant 9.99999997E-7 : f32
      %29 = vector.broadcast %cst_18 : f32 to vector<256x1xf32>
      %30 = arith.addf %28, %29 : vector<256x1xf32>
      %31 = tpu.reciprocal %30 {approx = true} : vector<256x1xf32> -> vector<256x1xf32>
      %32 = vector.broadcast %19 : vector<256x1xf32> to vector<256x128xf32>
      %33 = arith.subf %12, %32 : vector<256x128xf32>
      %34 = vector.broadcast %31 : vector<256x1xf32> to vector<256x128xf32>
      %35 = arith.mulf %33, %34 : vector<256x128xf32>
      %36 = arith.truncf %35 : vector<256x128xf32> to vector<256x128xbf16>
      %c0_19 = arith.constant 0 : index
      %c0_20 = arith.constant 0 : index
      %37 = vector.load %arg6[%c0_19, %c0_20] : memref<256x128xbf16, #tpu.memory_space<vmem>>, vector<256x128xbf16>
      tpu.vector_store %arg6[%c0_19, %c0_20], %36 {strides = array<i32>} : memref<256x128xbf16, #tpu.memory_space<vmem>>, vector<256x128xbf16>,
    } else {
    }
    %c0 = arith.constant 0 : index
    %c0_1 = arith.constant 0 : index
    %3 = vector.load %arg6[%c0, %c0_1] : memref<256x128xbf16, #tpu.memory_space<vmem>>, vector<256x128xbf16>
    %c0_2 = arith.constant 0 : index
    %c0_3 = arith.constant 0 : index
    %4 = vector.load %arg3[%c0_2, %c0_3] : memref<128x128xbf16, #tpu.memory_space<vmem>>, vector<128x128xbf16>
    %cst = arith.constant dense<0.000000e+00> : vector<256x128xf32>
    %5 = tpu.matmul %3, %4, %cst {dimension_numbers = #tpu.dot_dimension_numbers<[1], [0], [0], [1], [0, 0, 1, 1], [], []>} : vector<256x128xbf16>, vector<128x128xbf16>, vector<256x128xf32> -> vector<256x128xf32>
    %c0_4 = arith.constant 0 : index
    %c0_5 = arith.constant 0 : index
    %6 = vector.load %arg4[%c0_4, %c0_5] : memref<1x128xf32, #tpu.memory_space<vmem>>, vector<1x128xf32>
    %7 = vector.broadcast %6 : vector<1x128xf32> to vector<256x128xf32>
    %8 = arith.addf %5, %7 : vector<256x128xf32>
    %c0_6 = arith.constant 0 : index
    %c0_7 = arith.constant 0 : index
    %9 = vector.load %arg2[%c0_6, %c0_7] : memref<256x128xf32, #tpu.memory_space<vmem>>, vector<256x128xf32>
    %10 = arith.addf %9, %8 : vector<256x128xf32>
    %c0_8 = arith.constant 0 : index
    %c0_9 = arith.constant 0 : index
    %11 = vector.load %arg5[%c0_8, %c0_9] : memref<256x128xf32, #tpu.memory_space<vmem>>, vector<256x128xf32>
    tpu.vector_store %arg5[%c0_8, %c0_9], %10 {strides = array<i32>} : memref<256x128xf32, #tpu.memory_space<vmem>>, vector<256x128xf32>,
    return
  }
  func.func @transform_0(%arg0: i32, %arg1: i32) -> (i32, i32) {
    %c0_i32 = arith.constant 0 : i32
    %c0_i32_0 = arith.constant 0 : i32
    return %arg0, %c0_i32 : i32, i32
  }
  func.func @transform_1(%arg0: i32, %arg1: i32) -> (i32, i32) {
    %c0_i32 = arith.constant 0 : i32
    %c0_i32_0 = arith.constant 0 : i32
    return %c0_i32, %arg1 : i32, i32
  }
  func.func @transform_2(%arg0: i32, %arg1: i32) -> (i32, i32) {
    %c0_i32 = arith.constant 0 : i32
    %c0_i32_0 = arith.constant 0 : i32
    return %c0_i32, %arg1 : i32, i32
  }
  func.func @transform_3(%arg0: i32, %arg1: i32) -> (i32, i32) {
    %c0_i32 = arith.constant 0 : i32
    return %arg0, %arg1 : i32, i32
  }
}

</mosaic_0001>

<bundles_post_ra>
// kernel: tpu_custom_call.1
= control target key start
LH: loop header
LB: loop body
LE: loop exit
PB: predicated region body
PF: predicated region fallthrough
CT: control target
= control target key end

     0   :  { %s3490_s0 = inlined_call_operand.hbm [shape: f32[512,128], index: 0, kind: input, shape index: {}]   ;;  %s3491_s1 = inlined_call_operand.hbm [shape: bf16[128,128], index: 1, kind: input, shape index: {}]   ;;  %s3492_s2 = inlined_call_operand.vmem [shape: f32[1,128], index: 2, kind: input, shape index: {}]   ;;  %s3493_s3 = inlined_call_operand.hbm [shape: f32[512,128], index: 3, kind: output, shape index: {}]  }
   0x1   :  { %3494 = sst [smem:[#allocation12_spill]] %s3491_s1 }
   0x2   :  { %8 = vsyncpa [#allocation4], 0 }
   0x3   :  { %10 = vsyncpa [#allocation4 + $0x1], 0 }
   0x4   :  { %11 = vsyncpa [#allocation7], 0 }
   0x5   :  { %12 = vsyncpa [#allocation5], 0 }
   0x6   :  { %14 = vsyncpa [#allocation5 + $0x1], 0  ;;  %s2371_s12 = smov 0   ;;  %s2373_s13 = smov 0  }
   0x7   :  { %s2375_s14 = smov 0   ;;  %s2377_s15 = smov 0  }
   0x8   :  { %s2379_s16 = smov 0   ;;  %s2381_s17 = smov 0  }
   0x9 LB: > { %s1714_s18 = sadd.s32 4294967295, %s2342_s17   ;;  %s1715_s19 = sadd.s32 4294967294, %s2342_s17   ;;  %s2342_s17 = sphi %s2381_s17, %s20_s17   ;;  %s2338_s16 = sphi %s2379_s16, %s3510_s16   ;;  %s2334_s15 = sphi %s2377_s15, %s3509_s15   ;;  %s2330_s14 = sphi %s2375_s14, %s3508_s14   ;;  %s2326_s13 = sphi %s2373_s13, %s3507_s13   ;;  %s2322_s12 = sphi %s2371_s12, %s3506_s12  }
   0xa   : > { %p52_p0 = scmp.ne.s32.totalorder %s2326_s13, %s2322_s12  ;;  %p2405_p1 = scmp.eq.s32.totalorder %s1714_s18, 0 }
   0xb   : > { %p2409_p2 = scmp.eq.s32.totalorder %s1714_s18, 1  ;;  %p136_p3 = scmp.eq.s32.totalorder %s1715_s19, 1 }
   0xc   : > { %p2415_p4 = por %p2405_p1, %p52_p0  ;;  %p1716_p5 = scmp.ge.s32.totalorder %s2342_s17, 1 }
   0xd   : > { %p2420_p6 = por %p136_p3, %p52_p0  ;;  %p143_p7 = scmp.lt.s32.totalorder %s2342_s17, 3 }
   0xe   : > { %s3499_s1 = sld [smem:[#allocation12_spill]]  ;;  %s2344_s28 = smov [#allocation6]  }
   0xf   : > { %p2428_p8 = pnand %p1716_p5, %p143_p7  ;;  %s158_s29 = sshll.u32 %s2344_s28, 4  ;;  %s159_s29 = int_to_ptr.vmem [resolvable:$true] %s158_s29 }
  0x10   : > { %p1719_p11 = scmp.ge.s32.totalorder %s2342_s17, 2  ;;  %s2345_s30 = smov 64  }
  0x11   : > { %p1981_p9 = pneg %p2428_p8  ;;  %s2346_s4 = smov 4  }
  0x12   : > { %s32_s5 = sadd.s32 1, %s2338_s16  ;;  %s39_s6 = sadd.s32 1, %s2330_s14 }
  0x13   : > { %p1982_p10 = pnand %p1981_p9, %p2405_p1  ;;  %p34_p12 = scmp.ge.s32.totalorder %s32_s5, 2 }
  0x14   : > { %s156_s26 = sshll.u32 %s3499_s1, 4  ;;  %p46_p13 = scmp.ne.s32.totalorder %s2330_s14, %s2326_s13  ;;  %s157_s26 = int_to_ptr.hbm [resolvable:$true] %s156_s26 }
  0x15   : > { %1984 = dma.hbm_to_vmem [thread:$0]  (!%p1982_p10), %s157_s26, 1024, %s159_s29, [#allocation7], %s2345_s30, %s2345_s30, %s2346_s4  }
  0x16   : > { %p47_p0 = scmp.eq.s32.totalorder %s2342_s17, 0  ;;  %s3512_s5 = smov (%p34_p12, %s32_s5), 0 }
  0x17   : > { %p2450_p5 = por %p2409_p2, %p46_p13  ;;  %s36_s9 = ssub.s32 %s2338_s16, %s3512_s5 }
  0x18   : > { %p2444_p3 = por %p47_p0, %p46_p13  ;;  %p1994_p7 = scmp.lt.s32.totalorder %s2342_s17, 2 }
  0x19   : > { %p37_p9 = scmp.eq.s32.totalorder %s36_s9, 0  ;;  %s178_s10 = sand.u32 1, %s2330_s14  }
  0x1a   : > { %s1720_s11 = sshll.u32 %s178_s10, 8  ;;  %s1828_s19 = sshll.u32 %s2338_s16, 8 }
  0x1b   : > { %s2459_s18 = scalar_select %p37_p9, %s2330_s14, %s39_s6  }
  0x1c   : > { %s187_s26 = scalar_lea.hbm %s3490_s0, %s1828_s19  ;;  %s182_s28 = scalar_lea.vmem [#allocation3], %s1720_s11 }
  0x1d   : > { %s190_s29 = sshll.u32 %s182_s28, 4  ;;  %s188_s21 = sshll.u32 %s187_s26, 4  ;;  %s191_s29 = int_to_ptr.vmem [resolvable:$true] %s190_s29  ;;  %s189_s21 = int_to_ptr.hbm [resolvable:$true] %s188_s21 }
  0x1e   : > { %p1986_p2 = pnand %p1994_p7, %p2444_p3  ;;  %s179_s30 = scalar_lea.sflag [#allocation4], %s178_s10 }
  0x1f   : > { %s2347_s4 = smov 128   ;;  %s2348_s1 = smov 8  }
  0x20   : > { %1988 = dma.hbm_to_vmem [thread:$0]  (!%p1986_p2), %s189_s21, 4096, %s191_s29, %s179_s30, %s2347_s4, %s2347_s4, %s2348_s1  }
  0x21   : > { %202 = sbr.rel (%p2428_p8) target bundleno = 529 (0x211), region = 32  ;;  %s2470_s6 = sand.u32 (!%p2428_p8), 1, %s2326_s13  }
  0x22   : > { %s1724_s9 = sshll.u32 (!%p2428_p8), %s2470_s6, 8  ;;  %s205_s11 = scalar_lea.sflag (!%p2428_p8), [#allocation4], %s2470_s6 }
  0x23   : > { %s2476_s19 = scalar_lea.vmem (!%p2428_p8), [#allocation3], %s1724_s9 }
  0x26   : > { %2309 = dma.done.wait (%p2415_p4), %s205_s11, 4096  }
  0x27   : > { %2311 = vsyncadd (%p2415_p4), %s205_s11, 4294963200 }
  0x28   : > { %2313 = dma.done.wait (%p2405_p1), [#allocation7], 1024  }
  0x29   : > { %2315 = vsyncadd (%p2405_p1), [#allocation7], 4294966272  ;;  %v2487_v0 = vld [vmem:[%s2476_s19 + $0xc0] sm:$0xff]  ;;  %v2499_v3 = vld [vmem:[%s2476_s19 + $0xc8] sm:$0xff]  ;;  %s3359_s22 = scalar_lea.vmem [#allocation8], %s1724_s9  ;;  %s1853_s27 = sshll.u32 %s2334_s15, 8 }
  0x2a   : > { %v2490_v1 = vld [vmem:[%s2476_s19 + $0x80] sm:$0xff]  ;;  %329 = vadd.xlane.f32.xlu1 %v2487_v0  ;;  %v2502_v4 = vld [vmem:[%s2476_s19 + $0x88] sm:$0xff]  ;;  %v369_v9 = vmul.f32 %v2487_v0, %v2487_v0  ;;  %v370_v11 = vmul.f32 %v2499_v3, %v2499_v3  ;;  %v2535_v16 = vld [vmem:[%s2476_s19 + $0x90] sm:$0xff]  ;;  %s1603_s24 = scalar_lea.hbm %s3493_s3, %s1853_s27  ;;  %s1604_s25 = sshll.u32 %s3359_s22, 4  ;;  %s1605_s25 = int_to_ptr.vmem [resolvable:$true] %s1604_s25 }
  0x2b   : > { %v2493_v2 = vld [vmem:[%s2476_s19] sm:$0xff]  ;;  %313 = vadd.xlane.f32.xlu0 %v2490_v1  ;;  %v2505_v5 = vld [vmem:[%s2476_s19 + $0x8] sm:$0xff]  ;;  %v361_v8 = vmul.f32 %v2490_v1, %v2490_v1  ;;  %v362_v10 = vmul.f32 %v2502_v4, %v2502_v4  ;;  %v2538_v17 = vld [vmem:[%s2476_s19 + $0x98] sm:$0xff]  ;;  %v363_v25 = vmul.f32 %v2535_v16, %v2535_v16  ;;  %s1606_s26 = sshll.u32 %s1603_s24, 4  ;;  %s1591_s15 = scalar_lea.sflag [#allocation5], %s2470_s6  ;;  %s1607_s26 = int_to_ptr.hbm [resolvable:$true] %s1606_s26 }
  0x2c   : > { %281 = vadd.xlane.f32.xlu2 %v2493_v2  ;;  %v2511_v6 = vld [vmem:[%s2476_s19 + $0x48] sm:$0xff]  ;;  %v2514_v7 = vld [vmem:[%s2476_s19 + $0x40] sm:$0xff]  ;;  %v346_v12 = vmul.f32 %v2505_v5, %v2505_v5  ;;  %v345_v13 = vmul.f32 %v2493_v2, %v2493_v2  ;;  %v2543_v18 = vld [vmem:[%s2476_s19 + $0xd8] sm:$0xff]  ;;  %v364_v24 = vmul.f32 %v2538_v17, %v2538_v17  ;;  %s2270_s28 = sshra.s32 %s1607_s26, 4  ;;  %s2276_s4 = scalar_lea.hbm %s3493_s3, 512  ;;  %s2271_s28 = int_to_ptr.hbm [resolvable:$true] %s2270_s28 }
  0x2d   : > { %v353_v14 = vmul.f32 %v2514_v7, %v2514_v7  ;;  %v354_v15 = vmul.f32 %v2511_v6, %v2511_v6  ;;  %v2546_v19 = vld [vmem:[%s2476_s19 + $0xd0] sm:$0xff]  ;;  %v2558_v22 = vld [vmem:[%s2476_s19 + $0x18] sm:$0xff]  ;;  %v372_v28 = vmul.f32 %v2543_v18, %v2543_v18  ;;  %v2583_v32 = vld [vmem:[%s2476_s19 + $0xa0] sm:$0xff]  ;;  %s2272_s29 = scalar_lea.hbm %s2271_s28, 256  ;;  %p2277_p10 = scmp.lt.s32.totalorder %s2271_s28, %s3493_s3 }
  0x2e   : > { %v2549_v20 = vld [vmem:[%s2476_s19 + $0x10] sm:$0xff]  ;;  %v2561_v23 = vld [vmem:[%s2476_s19 + $0x58] sm:$0xff]  ;;  %v371_v26 = vmul.f32 %v2546_v19, %v2546_v19  ;;  %v348_v29 = vmul.f32 %v2558_v22, %v2558_v22  ;;  %v277_v33 = vld [vmem:[%s2476_s19 + $0xe0] sm:$0xff]  ;;  %v365_v39 = vmul.f32 %v2583_v32, %v2583_v32  ;;  %p2273_p1 = scmp.ne.s32.totalorder %s2271_s28, %s2272_s29  ;;  %p2278_p12 = scmp.lt.s32.totalorder %s2276_s4, %s2272_s29 }
  0x2f   : > { %v2555_v21 = vld [vmem:[%s2476_s19 + $0x50] sm:$0xff]  ;;  %v347_v27 = vmul.f32 %v2549_v20, %v2549_v20  ;;  %v356_v30 = vmul.f32 %v2561_v23, %v2561_v23  ;;  %v270_v34 = vld [vmem:[%s2476_s19 + $0xa8] sm:$0xff]  ;;  %v253_v37 = vld [vmem:[%s2476_s19 + $0x20] sm:$0xff]  ;;  %v373_v43 = vmul.f32 %v277_v33, %v277_v33 }
  0x30   : > { %v355_v31 = vmul.f32 %v2555_v21, %v2555_v21  ;;  %v278_v35 = vld [vmem:[%s2476_s19 + $0xe8] sm:$0xff]  ;;  %v261_v38 = vld [vmem:[%s2476_s19 + $0x60] sm:$0xff]  ;;  %v366_v40 = vmul.f32 %v270_v34, %v270_v34  ;;  %v349_v44 = vmul.f32 %v253_v37, %v253_v37  ;;  %v2598_v55 = vld [vmem:[%s2476_s19 + $0xb8] sm:$0xff]  ;;  %p2274_p4 = pnand %p2273_p1, %p2450_p5  ;;  %p2279_p13 = por %p2278_p12, %p2277_p10 }
  0x31   : > { %v254_v36 = vld [vmem:[%s2476_s19 + $0x28] sm:$0xff]  ;;  %v374_v42 = vmul.f32 %v278_v35, %v278_v35  ;;  %v357_v48 = vmul.f32 %v261_v38, %v261_v38  ;;  %v271_v56 = vld [vmem:[%s2476_s19 + $0xb0] sm:$0xff] }
  0x32   : > { %331 = vadd.xlane.f32.xlu1 %v2499_v3  ;;  %v262_v41 = vld [vmem:[%s2476_s19 + $0x68] sm:$0xff]  ;;  %v350_v49 = vmul.f32 %v254_v36, %v254_v36  ;;  %v2602_v57 = vld [vmem:[%s2476_s19 + $0xf0] sm:$0xff]  ;;  %p2275_p8 = pneg %p2274_p4 }
  0x33   : > { %315 = vadd.xlane.f32.xlu0 %v2502_v4  ;;  %v358_v50 = vmul.f32 %v262_v41, %v262_v41 }
  0x34   : > { %283 = vadd.xlane.f32.xlu2 %v2505_v5  ;;  %p2280_p0 = pnand %p2279_p13, %p2275_p8 }
  0x3a   : > { %299 = vadd.xlane.f32.xlu1 %v2511_v6 }
  0x3b   : > { %297 = vadd.xlane.f32.xlu0 %v2514_v7 }
  0x3c   : > { %409 = vadd.xlane.f32.xlu2 %v361_v8 }
  0x42   : > { %425 = vadd.xlane.f32.xlu1 %v369_v9 }
  0x43   : > { %411 = vadd.xlane.f32.xlu0 %v362_v10 }
  0x44   : > { %427 = vadd.xlane.f32.xlu2 %v370_v11  ;;  %v2615_v11 = vld [vmem:[%s2476_s19 + $0x30] sm:$0xff] }
  0x4a   : > { %379 = vadd.xlane.f32.xlu1 %v346_v12  ;;  %v2618_v12 = vld [vmem:[%s2476_s19 + $0xf8] sm:$0xff] }
  0x4b   : > { %377 = vadd.xlane.f32.xlu0 %v345_v13  ;;  %v2621_v13 = vld [vmem:[%s2476_s19 + $0x38] sm:$0xff] }
  0x4c   : > { %393 = vadd.xlane.f32.xlu2 %v353_v14 }
  0x52   : > { %317 = vadd.xlane.f32.xlu1 %v2535_v16 }
  0x53   : > { %395 = vadd.xlane.f32.xlu0 %v354_v15 }
  0x54   : > { %319 = vadd.xlane.f32.xlu2 %v2538_v17 }
  0x5a   : > { %335 = vadd.xlane.f32.xlu1 %v2543_v18 }
  0x5b   : > { %333 = vadd.xlane.f32.xlu0 %v2546_v19 }
  0x5c   : > { %285 = vadd.xlane.f32.xlu2 %v2549_v20 }
  0x62   : > { %301 = vadd.xlane.f32.xlu1 %v2555_v21 }
  0x63   : > { %287 = vadd.xlane.f32.xlu0 %v2558_v22 }
  0x64   : > { %303 = vadd.xlane.f32.xlu2 %v2561_v23 }
  0x6a   : > { %415 = vadd.xlane.f32.xlu1 %v364_v24 }
  0x6b   : > { %413 = vadd.xlane.f32.xlu0 %v363_v25 }
  0x6c   : > { %429 = vadd.xlane.f32.xlu2 %v371_v26  ;;  %v1852_v26 = vld [vmem:[#allocation6 + $0x38] sm:$0xff] }
  0x6d   : > { %1950 = vmatpush.bf16.msra.mxu2 %v1852_v26  ;;  %1951 = vmatpush.bf16.msra.mxu3 %v1852_v26 }
  0x6e   : > { %1405 = vmatpush.bf16.msra.mxu0 %v1852_v26  ;;  %1949 = vmatpush.bf16.msra.mxu1 %v1852_v26 }
  0x72   : > { %381 = vadd.xlane.f32.xlu1 %v347_v27 }
  0x73   : > { %431 = vadd.xlane.f32.xlu0 %v372_v28 }
  0x74   : > { %383 = vadd.xlane.f32.xlu2 %v348_v29 }
  0x7a   : > { %399 = vadd.xlane.f32.xlu1 %v356_v30 }
  0x7b   : > { %397 = vadd.xlane.f32.xlu0 %v355_v31 }
  0x7c   : > { %321 = vadd.xlane.f32.xlu2 %v2583_v32 }
  0x82   : > { %337 = vadd.xlane.f32.xlu1 %v277_v33 }
  0x83   : > { %323 = vadd.xlane.f32.xlu0 %v270_v34 }
  0x84   : > { %339 = vadd.xlane.f32.xlu2 %v278_v35 }
  0x8a   : > { %291 = vadd.xlane.f32.xlu1 %v254_v36 }
  0x8b   : > { %289 = vadd.xlane.f32.xlu0 %v253_v37  ;;  %v1851_v37 = vld [vmem:[#allocation6 + $0x30] sm:$0xff] }
  0x8c   : > { %305 = vadd.xlane.f32.xlu2 %v261_v38  ;;  %1953 = vmatpush.bf16.msra.mxu2 %v1851_v37 }
  0x8d   : > { %1954 = vmatpush.bf16.msra.mxu3 %v1851_v37  ;;  %1406 = vmatpush.bf16.msra.mxu0 %v1851_v37 }
  0x8e   : > { %1952 = vmatpush.bf16.msra.mxu1 %v1851_v37  ;;  %v376_v37 = vmul.f32 %v2618_v12, %v2618_v12 }
  0x92   : > { %417 = vadd.xlane.f32.xlu1 %v365_v39 }
  0x93   : > { %307 = vadd.xlane.f32.xlu0 %v262_v41 }
  0x94   : > { %419 = vadd.xlane.f32.xlu2 %v366_v40 }
  0x9a   : > { %435 = vadd.xlane.f32.xlu1 %v374_v42  ;;  %v2642_v42 = vld [vmem:[%s2476_s19 + $0x78] sm:$0xff] }
  0x9b   : > { %433 = vadd.xlane.f32.xlu0 %v373_v43  ;;  %v367_v43 = vmul.f32 %v271_v56, %v271_v56 }
  0x9c   : > { %385 = vadd.xlane.f32.xlu2 %v349_v44  ;;  %v263_v44 = vld [vmem:[%s2476_s19 + $0x70] sm:$0xff] }
  0x9d   : > { %v330_v45 = vpop.xlane.xlu1 %329 }
  0x9e   : > { %v314_v46 = vpop.xlane.xlu0 %313  ;;  %v2607_v59 = vmul.f32 0.0078125, %v330_v45 }
  0x9f   : > { %v282_v47 = vpop.xlane.xlu2 %281  ;;  %v2595_v51 = vmul.f32 0.0078125, %v314_v46 }
  0xa0   : > { %v497_v14 = vmul.f32 128.0, %v2607_v59  ;;  %v2631_v28 = vmul.f32 0.0078125, %v282_v47 }
  0xa1   : > { %v489_v58 = vmul.f32 128.0, %v2595_v51 }
  0xa2   : > { %401 = vadd.xlane.f32.xlu1 %v357_v48  ;;  %v529_v29 = vmul.f32 %v497_v14, %v2607_v59  ;;  %v473_v47 = vmul.f32 128.0, %v2631_v28 }
  0xa3   : > { %387 = vadd.xlane.f32.xlu0 %v350_v49  ;;  %v521_v8 = vmul.f32 %v489_v58, %v2595_v51 }
  0xa4   : > { %403 = vadd.xlane.f32.xlu2 %v358_v50 }
  0xa5   : > { %v332_v52 = vpop.xlane.xlu1 %331 }
  0xa6   : > { %v316_v53 = vpop.xlane.xlu0 %315  ;;  %v2611_v61 = vmul.f32 0.0078125, %v332_v52  ;;  %v1850_v52 = vld [vmem:[#allocation6 + $0x28] sm:$0xff] }
  0xa7   : > { %v284_v54 = vpop.xlane.xlu2 %283  ;;  %v2609_v60 = vmul.f32 0.0078125, %v316_v53  ;;  %1956 = vmatpush.bf16.msra.mxu2 %v1850_v52  ;;  %1957 = vmatpush.bf16.msra.mxu3 %v1850_v52 }
  0xa8   : > { %v498_v25 = vmul.f32 128.0, %v2611_v61  ;;  %v2635_v31 = vmul.f32 0.0078125, %v284_v54  ;;  %1407 = vmatpush.bf16.msra.mxu0 %v1850_v52  ;;  %1955 = vmatpush.bf16.msra.mxu1 %v1850_v52  ;;  %v359_v52 = vmul.f32 %v263_v44, %v263_v44 }
  0xa9   : > { %v490_v15 = vmul.f32 128.0, %v2609_v60 }
  0xaa   : > { %327 = vadd.xlane.f32.xlu1 %v2598_v55  ;;  %v530_v36 = vmul.f32 %v498_v25, %v2611_v61  ;;  %v474_v49 = vmul.f32 128.0, %v2635_v31  ;;  %v1849_v25 = vld [vmem:[#allocation6 + $0x20] sm:$0xff] }
  0xab   : > { %325 = vadd.xlane.f32.xlu0 %v271_v56  ;;  %v522_v30 = vmul.f32 %v490_v15, %v2609_v60  ;;  %1959 = vmatpush.bf16.msra.mxu2 %v1849_v25 }
  0xac   : > { %341 = vadd.xlane.f32.xlu2 %v2602_v57  ;;  %1960 = vmatpush.bf16.msra.mxu3 %v1849_v25 }
  0xad   : > { %v300_v62 = vpop.xlane.xlu1 %299  ;;  %1408 = vmatpush.bf16.msra.mxu0 %v1849_v25  ;;  %1958 = vmatpush.bf16.msra.mxu1 %v1849_v25  ;;  %v1847_v25 = vld [vmem:[#allocation6 + $0x10] sm:$0xff] }
  0xae   : > { %v298_v63 = vpop.xlane.xlu0 %297  ;;  %v2648_v53 = vmul.f32 0.0078125, %v300_v62 }
  0xaf   : > { %v410_v9 = vpop.xlane.xlu2 %409  ;;  %v2637_v33 = vmul.f32 0.0078125, %v298_v63 }
  0xb0   : > { %v553_v10 = vsub.f32 %v410_v9, %v521_v8  ;;  %v505_v9 = vmul.f32 %v473_v47, %v2631_v28 }
  0xb1   : > { %v481_v50 = vmul.f32 128.0, %v2637_v33 }
  0xb2   : > { %v585_v24 = vmul.f32 0.007874016, %v553_v10  ;;  %293 = vadd.xlane.f32.xlu1 %v2615_v11  ;;  %v506_v10 = vmul.f32 %v474_v49, %v2635_v31 }
  0xb3   : > { %343 = vadd.xlane.f32.xlu0 %v2618_v12  ;;  %v513_v14 = vmul.f32 %v481_v50, %v2637_v33  ;;  %v352_v12 = vmul.f32 %v2621_v13, %v2621_v13 }
  0xb4   : > { %v2628_v27 = vmax.f32 %v585_v24, 0.0  ;;  %295 = vadd.xlane.f32.xlu2 %v2621_v13  ;;  %v375_v24 = vmul.f32 %v2602_v57, %v2602_v57 }
  0xb5   : > { %v426_v34 = vpop.xlane.xlu1 %425 }
  0xb6   : > { %2053 = vrsqrt.f32 %v2628_v27  ;;  %v412_v35 = vpop.xlane.xlu0 %411  ;;  %v561_v38 = vsub.f32 %v426_v34, %v529_v29  ;;  %v482_v34 = vmul.f32 128.0, %v2648_v53  ;;  %vm832_vm0 = vcmp.eq.f32.partialorder %v2628_v27, inf }
  0xb7   : > { %v554_v39 = vsub.f32 %v412_v35, %v522_v30  ;;  %v428_v40 = vpop.xlane.xlu2 %427  ;;  %v368_v30 = vmul.f32 %v2598_v55, %v2598_v55  ;;  %vm834_vm1 = vcmp.eq.f32.partialorder %v2628_v27, 0.0 }
  0xb8   : > { %v562_v41 = vsub.f32 %v428_v40, %v530_v36  ;;  %v593_v45 = vmul.f32 0.007874016, %v561_v38  ;;  %v2672_v55 = vmul.f32 %v482_v34, %v2648_v53 }
  0xb9   : > { %v586_v46 = vmul.f32 0.007874016, %v554_v39 }
  0xba   : > { %v594_v48 = vmul.f32 0.007874016, %v562_v41  ;;  %v2650_v54 = vmax.f32 %v593_v45, 0.0  ;;  %311 = vadd.xlane.f32.xlu1 %v2642_v42  ;;  %v1848_v41 = vld [vmem:[#allocation6 + $0x18] sm:$0xff] }
  0xbb   : > { %v2652_v56 = vmax.f32 %v586_v46, 0.0  ;;  %309 = vadd.xlane.f32.xlu0 %v263_v44  ;;  %1962 = vmatpush.bf16.msra.mxu2 %v1848_v41 }
  0xbc   : > { %v2054_v58 = vpop.eup %2053  ;;  %v2655_v63 = vmax.f32 %v594_v48, 0.0  ;;  %421 = vadd.xlane.f32.xlu2 %v367_v43  ;;  %2055 = vrsqrt.f32 %v2650_v54  ;;  %1963 = vmatpush.bf16.msra.mxu3 %v1848_v41  ;;  %vm928_vm2 = vcmp.eq.f32.partialorder %v2650_v54, inf  ;;  %vm930_vm3 = vcmp.eq.f32.partialorder %v2650_v54, 0.0 }
  0xbd   : > { %v826_v8 = vmul.f32 %v2054_v58, %v2628_v27  ;;  %2057 = vrsqrt.f32 %v2652_v56  ;;  %v380_v62 = vpop.xlane.xlu1 %379  ;;  %1409 = vmatpush.bf16.msra.mxu0 %v1848_v41  ;;  %1961 = vmatpush.bf16.msra.mxu1 %v1848_v41  ;;  %vm844_vm4 = vcmp.eq.f32.partialorder %v2652_v56, inf  ;;  %vm846_vm5 = vcmp.eq.f32.partialorder %v2652_v56, 0.0 }
  0xbe   : > { %v378_v15 = vpop.xlane.xlu0 %377  ;;  %2059 = vrsqrt.f32 %v2655_v63  ;;  %v538_v35 = vsub.f32 %v380_v62, %v506_v10  ;;  %v351_v10 = vmul.f32 %v2615_v11, %v2615_v11  ;;  %vm940_vm6 = vcmp.eq.f32.partialorder %v2655_v63, inf }
  0xbf   : > { %v827_v26 = vmul.f32 %v2054_v58, %v826_v8  ;;  %v394_v29 = vpop.xlane.xlu2 %393  ;;  %v537_v39 = vsub.f32 %v378_v15, %v505_v9  ;;  %1965 = vmatpush.bf16.msra.mxu2 %v1847_v25  ;;  %vm942_vm7 = vcmp.eq.f32.partialorder %v2655_v63, 0.0 }
  0xc0   : > { %v545_v36 = vsub.f32 %v394_v29, %v513_v14  ;;  %v570_v57 = vmul.f32 0.007874016, %v538_v35  ;;  %v835_v29 = vand.u32 2147483648, %v2628_v27  ;;  %1966 = vmatpush.bf16.msra.mxu3 %v1847_v25 }
  0xc1   : > { %v828_v38 = vmul.f32 0.5, %v827_v26  ;;  %v569_v46 = vmul.f32 0.007874016, %v537_v39  ;;  %1410 = vmatpush.bf16.msra.mxu0 %v1847_v25  ;;  %1964 = vmatpush.bf16.msra.mxu1 %v1847_v25 }
  0xc2   : > { %v577_v40 = vmul.f32 0.007874016, %v545_v36  ;;  %v2056_v43 = vpop.eup %2055  ;;  %437 = vadd.xlane.f32.xlu1 %v375_v24  ;;  %v2677_v49 = vmax.f32 %v570_v57, 0.0 }
  0xc3   : > { %v829_v45 = vsub.f32 1.5, %v828_v38  ;;  %423 = vadd.xlane.f32.xlu0 %v368_v30  ;;  %v2058_v47 = vpop.eup %2057  ;;  %v922_v48 = vmul.f32 %v2056_v43, %v2650_v54  ;;  %v2686_v15 = vmax.f32 %v569_v46, 0.0 }
  0xc4   : > { %v2679_v50 = vmax.f32 %v577_v40, 0.0  ;;  %439 = vadd.xlane.f32.xlu2 %v376_v37  ;;  %v2060_v8 = vpop.eup %2059  ;;  %v838_v62 = vmul.f32 %v2058_v47, %v2652_v56  ;;  %2061 = vrsqrt.f32 %v2677_v49  ;;  %v360_v37 = vmul.f32 %v2642_v42, %v2642_v42 }
  0xc5   : > { %v830_v9 = vmul.f32 %v2054_v58, %v829_v45  ;;  %v923_v13 = vmul.f32 %v2056_v43, %v922_v48  ;;  %v934_v14 = vmul.f32 %v2060_v8, %v2655_v63  ;;  %v2688_v24 = vpop.xlane.xlu1 %317  ;;  %v931_v40 = vand.u32 2147483648, %v2650_v54 }
  0xc6   : > { %v396_v44 = vpop.xlane.xlu0 %395  ;;  %v839_v11 = vmul.f32 %v2058_v47, %v838_v62  ;;  %2063 = vrsqrt.f32 %v2679_v50  ;;  %vm652_vm8 = vcmp.eq.f32.partialorder %v2677_v49, inf  ;;  %vm654_vm9 = vcmp.eq.f32.partialorder %v2677_v49, 0.0 }
  0xc7   : > { %v831_v58 = vmul.f32 %v830_v9, %v2628_v27  ;;  %v2693_v26 = vpop.xlane.xlu2 %319  ;;  %v924_v30 = vmul.f32 0.5, %v923_v13  ;;  %v935_v34 = vmul.f32 %v2060_v8, %v934_v14  ;;  %2065 = vrsqrt.f32 %v2686_v15 }
  0xc8   : > { %v840_v36 = vmul.f32 0.5, %v839_v11  ;;  %v847_v9 = vand.u32 2147483648, %v2652_v56  ;;  %vm736_vm10 = vcmp.eq.f32.partialorder %v2679_v50, inf  ;;  %vm640_vm11 = vcmp.eq.f32.partialorder %v2686_v15, inf }
  0xc9   : > { %v833_v35 = vsel %vm832_vm0, %v2628_v27, %v831_v58  ;;  %v925_v39 = vsub.f32 1.5, %v924_v30  ;;  %v936_v57 = vmul.f32 0.5, %v935_v34  ;;  %v1846_v30 = vld [vmem:[#allocation6 + $0x8] sm:$0xff]  ;;  %vm642_vm12 = vcmp.eq.f32.partialorder %v2686_v15, 0.0 }
  0xca   : > { %v836_v38 = vsel %vm834_vm1, %v835_v29, %v833_v35  ;;  %v841_v41 = vsub.f32 1.5, %v840_v36  ;;  %391 = vadd.xlane.f32.xlu1 %v352_v12  ;;  %v2062_v27 = vpop.eup %2061  ;;  %v546_v12 = vsub.f32 %v396_v44, %v2672_v55  ;;  %1968 = vmatpush.bf16.msra.mxu2 %v1846_v30  ;;  %vm738_vm13 = vcmp.eq.f32.partialorder %v2679_v50, 0.0 }
  0xcb   : > { %389 = vadd.xlane.f32.xlu0 %v351_v10  ;;  %v1033_v45 = vadd.f32 1e-06, %v836_v38  ;;  %v926_v42 = vmul.f32 %v2056_v43, %v925_v39  ;;  %v937_v46 = vsub.f32 1.5, %v936_v57  ;;  %v646_v62 = vmul.f32 %v2062_v27, %v2677_v49  ;;  %1969 = vmatpush.bf16.msra.mxu3 %v1846_v30 }
  0xcc   : > { %405 = vadd.xlane.f32.xlu2 %v359_v52  ;;  %v842_v48 = vmul.f32 %v2058_v47, %v841_v41  ;;  %v2064_v13 = vpop.eup %2063  ;;  %v943_v52 = vand.u32 2147483648, %v2655_v63  ;;  %v578_v44 = vmul.f32 0.007874016, %v546_v12  ;;  %1411 = vmatpush.bf16.msra.mxu0 %v1846_v30 }
  0xcd   : > { %v927_v14 = vmul.f32 %v926_v42, %v2650_v54  ;;  %v938_v25 = vmul.f32 %v2060_v8, %v937_v46  ;;  %v2712_v43 = vpop.xlane.xlu1 %335  ;;  %v647_v58 = vmul.f32 %v2062_v27, %v646_v62  ;;  %v730_v11 = vmul.f32 %v2064_v13, %v2679_v50  ;;  %v2066_v34 = vpop.eup %2065  ;;  %1967 = vmatpush.bf16.msra.mxu1 %v1846_v30  ;;  %v1845_v62 = vld [vmem:[#allocation6] sm:$0xff] }
  0xce   : > { %v2714_v10 = vpop.xlane.xlu0 %333  ;;  %v843_v47 = vmul.f32 %v842_v48, %v2652_v56  ;;  %2067 = vrcp.f32 %v1033_v45  ;;  %v634_v42 = vmul.f32 %v2066_v34, %v2686_v15  ;;  %1971 = vmatpush.bf16.msra.mxu2 %v1845_v62 }
  0xcf   : > { %v2719_v29 = vpop.xlane.xlu2 %285  ;;  %v929_v55 = vsel %vm928_vm2, %v2650_v54, %v927_v14  ;;  %v939_v8 = vmul.f32 %v938_v25, %v2655_v63  ;;  %v648_v38 = vmul.f32 0.5, %v647_v58  ;;  %v731_v39 = vmul.f32 %v2064_v13, %v730_v11  ;;  %1972 = vmatpush.bf16.msra.mxu3 %v1845_v62 }
  0xd0   : > { %v932_v35 = vsel %vm930_vm3, %v931_v40, %v929_v55  ;;  %v845_v36 = vsel %vm844_vm4, %v2652_v56, %v843_v47  ;;  %v635_v56 = vmul.f32 %v2066_v34, %v634_v42  ;;  %v2740_v47 = vmax.f32 %v578_v44, 0.0  ;;  %1412 = vmatpush.bf16.msra.mxu0 %v1845_v62 }
  0xd1   : > { %v1041_v57 = vadd.f32 1e-06, %v932_v35  ;;  %v848_v41 = vsel %vm846_vm5, %v847_v9, %v845_v36  ;;  %v941_v45 = vsel %vm940_vm6, %v2655_v63, %v939_v8  ;;  %v649_v46 = vsub.f32 1.5, %v648_v38  ;;  %1970 = vmatpush.bf16.msra.mxu1 %v1845_v62 }
  0xd2   : > { %v1034_v54 = vadd.f32 1e-06, %v848_v41  ;;  %v944_v40 = vsel %vm942_vm7, %v943_v52, %v941_v45  ;;  %v732_v48 = vmul.f32 0.5, %v731_v39  ;;  %v1105_v9 = vsub.f32 %v2487_v0, %v2607_v59 }
  0xd3   : > { %407 = vadd.xlane.f32.xlu0 %v360_v37  ;;  %2069 = vrcp.f32 %v1041_v57  ;;  %v1042_v14 = vadd.f32 1e-06, %v944_v40  ;;  %v650_v25 = vmul.f32 %v2062_v27, %v649_v46  ;;  %v1097_v63 = vsub.f32 %v2490_v1, %v2595_v51 }
  0xd4   : > { %v733_v12 = vsub.f32 1.5, %v732_v48  ;;  %v2068_v58 = vpop.eup %2067  ;;  %v1106_v37 = vsub.f32 %v2499_v3, %v2611_v61  ;;  %2071 = vrcp.f32 %v1034_v54  ;;  %v636_v52 = vmul.f32 0.5, %v635_v56 }
  0xd5   : > { %v2746_v11 = vpop.xlane.xlu1 %301  ;;  %v1098_v0 = vsub.f32 %v2502_v4, %v2609_v60  ;;  %v651_v59 = vmul.f32 %v650_v25, %v2677_v49  ;;  %2073 = vrsqrt.f32 %v2740_v47  ;;  %v655_v1 = vand.u32 2147483648, %v2677_v49 }
  0xd6   : > { %v288_v30 = vpop.xlane.xlu0 %287  ;;  %v734_v27 = vmul.f32 %v2064_v13, %v733_v12  ;;  %2075 = vrcp.f32 %v1042_v14  ;;  %v637_v3 = vsub.f32 1.5, %v636_v52  ;;  %v739_v4 = vand.u32 2147483648, %v2679_v50 }
  0xd7   : > { %v2752_v55 = vpop.xlane.xlu2 %303  ;;  %v653_v51 = vsel %vm652_vm8, %v2677_v49, %v651_v59  ;;  %v2762_v44 = vmul.f32 0.0078125, %v2693_v26  ;;  %v2767_v35 = vmul.f32 0.0078125, %v2688_v24  ;;  %v2770_v49 = vmul.f32 0.0078125, %v2714_v10 }
  0xd8   : > { %v656_v61 = vsel %vm654_vm9, %v655_v1, %v653_v51  ;;  %v735_v13 = vmul.f32 %v734_v27, %v2679_v50  ;;  %v638_v8 = vmul.f32 %v2066_v34, %v637_v3  ;;  %v643_v57 = vand.u32 2147483648, %v2686_v15 }
  0xd9   : > { %v2070_v60 = vpop.eup %2069  ;;  %v1018_v38 = vadd.f32 1e-06, %v656_v61  ;;  %v2775_v34 = vmul.f32 0.0078125, %v2712_v43  ;;  %v1129_v41 = vmul.f32 %v2068_v58, %v1097_v63  ;;  %v2778_v42 = vmul.f32 0.0078125, %v2719_v29 }
  0xda   : > { %v2072_v36 = vpop.eup %2071  ;;  %v639_v39 = vmul.f32 %v638_v8, %v2686_v15  ;;  %v1137_v45 = vmul.f32 %v2070_v60, %v1105_v9  ;;  %v2780_v24 = vmul.f32 0.0078125, %v288_v30  ;;  %v737_v10 = vsel %vm736_vm10, %v2679_v50, %v735_v13 }
  0xdb   : > { %v2074_v26 = vpop.eup %2073  ;;  %v492_v48 = vmul.f32 128.0, %v2762_v44  ;;  %v1130_v14 = vmul.f32 %v2072_v36, %v1098_v0  ;;  %v499_v9 = vmul.f32 128.0, %v2770_v49  ;;  %v491_v25 = vmul.f32 128.0, %v2767_v35 }
  0xdc   : > { %v2076_v54 = vpop.eup %2075  ;;  %v641_v40 = vsel %vm640_vm11, %v2686_v15, %v639_v39  ;;  %v742_v43 = vmul.f32 %v2074_v26, %v2740_v47  ;;  %2077 = vrcp.f32 %v1018_v38  ;;  %v475_v0 = vmul.f32 128.0, %v2778_v42 }
  0xdd   : > { %v416_v46 = vpop.xlane.xlu1 %415  ;;  %v644_v29 = vsel %vm642_vm12, %v643_v57, %v641_v40  ;;  %v524_v63 = vmul.f32 %v492_v48, %v2762_v44  ;;  %v1138_v52 = vmul.f32 %v2076_v54, %v1106_v37  ;;  %v531_v30 = vmul.f32 %v499_v9, %v2770_v49 }
  0xde   : > { %v414_v62 = vpop.xlane.xlu0 %413  ;;  %v1017_v12 = vadd.f32 1e-06, %v644_v29  ;;  %v743_v58 = vmul.f32 %v2074_v26, %v742_v43  ;;  %v523_v59 = vmul.f32 %v491_v25, %v2767_v35  ;;  %v500_v1 = vmul.f32 128.0, %v2775_v34 }
  0xdf   : > { %v430_v56 = vpop.xlane.xlu2 %429  ;;  %v556_v27 = vsub.f32 %v416_v46, %v524_v63  ;;  %v1081_v3 = vsub.f32 %v2493_v2, %v2631_v28  ;;  %v740_v61 = vsel %vm738_vm13, %v739_v4, %v737_v10  ;;  %v1897_v8 = vpack.c.bf16 %v1130_v14, %v1129_v41 }
  0xe0   : > { %2079 = vrcp.f32 %v1017_v12  ;;  %v744_v15 = vmul.f32 0.5, %v743_v58  ;;  %v563_v51 = vsub.f32 %v430_v56, %v531_v30  ;;  %v555_v60 = vsub.f32 %v414_v62, %v523_v59 }
  0xe1   : > { %v588_v13 = vmul.f32 0.007874016, %v556_v27  ;;  %v476_v39 = vmul.f32 128.0, %v2780_v24  ;;  %v1917_v57 = vpack.c.bf16 %v1138_v52, %v1137_v45  ;;  %v507_v2 = vmul.f32 %v475_v0, %v2778_v42  ;;  %1941 = vst [vmem:[#allocation2 + $0x40] sm:$0xff] %v1897_v8  }
  0xe2   : > { %v745_v37 = vsub.f32 1.5, %v744_v15  ;;  %v595_v36 = vmul.f32 0.007874016, %v563_v51  ;;  %v587_v38 = vmul.f32 0.007874016, %v555_v60  ;;  %v2078_v54 = vpop.eup %2077  ;;  %v532_v28 = vmul.f32 %v500_v1, %v2775_v34 }
  0xe3   : > { %v2803_v43 = vmax.f32 %v588_v13, 0.0  ;;  %v1082_v4 = vsub.f32 %v2505_v5, %v2635_v31  ;;  %v2810_v41 = vmul.f32 0.0078125, %v2752_v55  ;;  %1945 = vst [vmem:[#allocation2 + $0x60] sm:$0xff] %v1917_v57   ;;  %v1025_v62 = vadd.f32 1e-06, %v740_v61 }
  0xe4   : > { %v746_v40 = vmul.f32 %v2074_v26, %v745_v37  ;;  %v2812_v10 = vmax.f32 %v595_v36, 0.0  ;;  %v2814_v45 = vmax.f32 %v587_v38, 0.0  ;;  %v508_v5 = vmul.f32 %v476_v39, %v2780_v24 }
  0xe5   : > { %v382_v46 = vpop.xlane.xlu1 %381  ;;  %2081 = vrsqrt.f32 %v2803_v43  ;;  %v1114_v56 = vmul.f32 %v2078_v54, %v1082_v4  ;;  %v1090_v31 = vsub.f32 %v2511_v6, %v2648_v53  ;;  %vm748_vm14 = vcmp.eq.f32.partialorder %v2740_v47, inf }
  0xe6   : > { %v432_v50 = vpop.xlane.xlu0 %431  ;;  %v2080_v48 = vpop.eup %2079  ;;  %v539_v14 = vsub.f32 %v382_v46, %v507_v2  ;;  %v747_v25 = vmul.f32 %v746_v40, %v2740_v47  ;;  %2083 = vrsqrt.f32 %v2812_v10  ;;  %v484_v55 = vmul.f32 128.0, %v2810_v41 }
  0xe7   : > { %v384_v26 = vpop.xlane.xlu2 %383  ;;  %v564_v29 = vsub.f32 %v432_v50, %v532_v28  ;;  %v1113_v9 = vmul.f32 %v2080_v48, %v1081_v3  ;;  %2085 = vrsqrt.f32 %v2814_v45  ;;  %v2826_v12 = vmul.f32 0.0078125, %v2746_v11 }
  0xe8   : > { %v571_v58 = vmul.f32 0.007874016, %v539_v14  ;;  %v540_v63 = vsub.f32 %v384_v26, %v508_v5  ;;  %v1089_v30 = vsub.f32 %v2514_v7, %v2637_v33  ;;  %2087 = vrcp.f32 %v1025_v62  ;;  %v1837_v0 = vld [vmem:[#allocation2 + $0x40] sm:$0xff] }
  0xe9   : > { %v596_v52 = vmul.f32 0.007874016, %v564_v29  ;;  %v749_v59 = vsel %vm748_vm14, %v2740_v47, %v747_v25  ;;  %v1857_v15 = vpack.c.bf16 %v1114_v56, %v1113_v9  ;;  %v751_v1 = vand.u32 2147483648, %v2740_v47  ;;  %1453 = vmatmul.bf16.vlgmr.msra.gmra.mxu2 %v1837_v0 }
  0xea   : > { %v2832_v3 = vmax.f32 %v571_v58, 0.0  ;;  %v572_v51 = vmul.f32 0.007874016, %v540_v63  ;;  %v1841_v11 = vld [vmem:[#allocation2 + $0x60] sm:$0xff]  ;;  %v1099_v7 = vsub.f32 %v2535_v16, %v2767_v35  ;;  %vm750_vm15 = vcmp.eq.f32.partialorder %v2740_v47, 0.0 }
  0xeb   : > { %v2082_v27 = vpop.eup %2081  ;;  %v2834_v60 = vmax.f32 %v596_v52, 0.0  ;;  %v516_v8 = vmul.f32 %v484_v55, %v2810_v41  ;;  %1858 = vst [vmem:[#allocation2 + $0x30] sm:$0xff] %v1857_v15   ;;  %v752_v39 = vsel %vm750_vm15, %v751_v1, %v749_v59  ;;  %1473 = vmatmul.bf16.vlgmr.msra.gmra.mxu3 %v1841_v11  ;;  %v483_v54 = vmul.f32 128.0, %v2826_v12 }
  0xec   : > { %v2838_v13 = vpop.eup %2083  ;;  %v862_v33 = vmul.f32 %v2082_v27, %v2803_v43  ;;  %2089 = vrsqrt.f32 %v2832_v3  ;;  %v2852_v46 = vmax.f32 %v572_v51, 0.0  ;;  %v1100_v28 = vsub.f32 %v2538_v17, %v2762_v44 }
  0xed   : > { %v400_v61 = vpop.xlane.xlu1 %399  ;;  %v2086_v38 = vpop.eup %2085  ;;  %v946_v57 = vmul.f32 %v2838_v13, %v2812_v10  ;;  %v1108_v50 = vsub.f32 %v2543_v18, %v2775_v34  ;;  %2091 = vrsqrt.f32 %v2834_v60  ;;  %v1083_v48 = vsub.f32 %v2549_v20, %v2778_v42  ;;  %v3029_v20 = vld [vmem:[%s2476_s19 + $0xe0] sm:$0xff]  ;;  %v3034_v42 = vld [vmem:[%s2476_s19 + $0xe8] sm:$0xff] }
  0xee   : > { %v2836_v37 = vpop.xlane.xlu0 %397  ;;  %v863_v40 = vmul.f32 %v2082_v27, %v862_v33  ;;  %v850_v47 = vmul.f32 %v2086_v38, %v2814_v45  ;;  %v548_v2 = vsub.f32 %v400_v61, %v516_v8  ;;  %v2088_v26 = vpop.eup %2087  ;;  %2093 = vrsqrt.f32 %v2852_v46 }
  0xef   : > { %v2845_v36 = vpop.xlane.xlu2 %321  ;;  %v947_v4 = vmul.f32 %v2838_v13, %v946_v57  ;;  %v1026_v29 = vadd.f32 1e-06, %v752_v39  ;;  %v515_v25 = vmul.f32 %v483_v54, %v2826_v12  ;;  %v2868_v59 = vmul.f32 %v2088_v26, %v1089_v30 }
  0xf0   : > { %v864_v62 = vmul.f32 0.5, %v863_v40  ;;  %v851_v14 = vmul.f32 %v2086_v38, %v850_v47  ;;  %v580_v63 = vmul.f32 0.007874016, %v548_v2  ;;  %v1084_v15 = vsub.f32 %v2558_v22, %v2780_v24 }
  0xf1   : > { %v948_v9 = vmul.f32 0.5, %v947_v4  ;;  %v547_v1 = vsub.f32 %v2836_v37, %v515_v25  ;;  %2095 = vrcp.f32 %v1026_v29  ;;  %vm868_vm0 = vcmp.eq.f32.partialorder %v2803_v43, inf }
  0xf2   : > { %v865_v55 = vsub.f32 1.5, %v864_v62  ;;  %v852_v58 = vmul.f32 0.5, %v851_v14  ;;  %v2090_v52 = vpop.eup %2089  ;;  %v1829_v51 = vld [vmem:[#allocation2 + $0x30] sm:$0xff]  ;;  %v2880_v57 = vmax.f32 %v580_v63, 0.0  ;;  %vm870_vm1 = vcmp.eq.f32.partialorder %v2803_v43, 0.0 }
  0xf3   : > { %v658_v39 = vmul.f32 %v2090_v52, %v2832_v3  ;;  %v2092_v54 = vpop.eup %2091  ;;  %v949_v37 = vsub.f32 1.5, %v948_v9  ;;  %1413 = vmatmul.bf16.vlgmr.msra.gmra.mxu0 %v1829_v51  ;;  %v871_v47 = vand.u32 2147483648, %v2803_v43  ;;  %v579_v14 = vmul.f32 0.007874016, %v547_v1 }
  0xf4   : > { %v866_v33 = vmul.f32 %v2082_v27, %v865_v55  ;;  %v853_v8 = vsub.f32 1.5, %v852_v58  ;;  %v2094_v40 = vpop.eup %2093  ;;  %v958_v4 = vmul.f32 %v2092_v54, %v2834_v60  ;;  %2097 = vrsqrt.f32 %v2880_v57 }
  0xf5   : > { %v2875_v11 = vpop.xlane.xlu1 %337  ;;  %v659_v27 = vmul.f32 %v2090_v52, %v658_v39  ;;  %v670_v62 = vmul.f32 %v2094_v40, %v2852_v46  ;;  %vm952_vm2 = vcmp.eq.f32.partialorder %v2812_v10, inf  ;;  %v955_v29 = vand.u32 2147483648, %v2812_v10 }
  0xf6   : > { %v2877_v61 = vpop.xlane.xlu0 %323  ;;  %v854_v2 = vmul.f32 %v2086_v38, %v853_v8  ;;  %v867_v26 = vmul.f32 %v866_v33, %v2803_v43  ;;  %vm856_vm3 = vcmp.eq.f32.partialorder %v2814_v45, inf  ;;  %v959_v25 = vmul.f32 %v2092_v54, %v958_v4 }
  0xf7   : > { %v2882_v30 = vpop.xlane.xlu2 %339  ;;  %v660_v9 = vmul.f32 0.5, %v659_v27  ;;  %v950_v38 = vmul.f32 %v2838_v13, %v949_v37  ;;  %vm858_vm4 = vcmp.eq.f32.partialorder %v2814_v45, 0.0  ;;  %v671_v58 = vmul.f32 %v2094_v40, %v670_v62  ;;  %v2096_v1 = vpop.eup %2095 }
  0xf8   : > { %v855_v55 = vmul.f32 %v854_v2, %v2814_v45  ;;  %v859_v63 = vand.u32 2147483648, %v2814_v45  ;;  %vm664_vm5 = vcmp.eq.f32.partialorder %v2832_v3, inf  ;;  %vm666_vm6 = vcmp.eq.f32.partialorder %v2832_v3, 0.0 }
  0xf9   : > { %v661_v51 = vsub.f32 1.5, %v660_v9  ;;  %v869_v33 = vsel %vm868_vm0, %v2803_v43, %v867_v26  ;;  %vm954_vm7 = vcmp.eq.f32.partialorder %v2812_v10, 0.0  ;;  %v672_v13 = vmul.f32 0.5, %v671_v58 }
  0xfa   : > { %v960_v8 = vmul.f32 0.5, %v959_v25  ;;  %v2904_v39 = vmax.f32 %v579_v14, 0.0  ;;  %v667_v4 = vand.u32 2147483648, %v2832_v3  ;;  %vm676_vm8 = vcmp.eq.f32.partialorder %v2852_v46, inf  ;;  %v2098_v9 = vpop.eup %2097 }
  0xfb   : > { %v662_v27 = vmul.f32 %v2090_v52, %v661_v51  ;;  %vm964_vm9 = vcmp.eq.f32.partialorder %v2834_v60, inf  ;;  %v951_v26 = vmul.f32 %v950_v38, %v2812_v10  ;;  %v857_v14 = vsel %vm856_vm3, %v2814_v45, %v855_v55 }
  0xfc   : > { %v673_v25 = vsub.f32 1.5, %v672_v13  ;;  %v961_v58 = vsub.f32 1.5, %v960_v8  ;;  %vm966_vm10 = vcmp.eq.f32.partialorder %v2834_v60, 0.0  ;;  %v1122_v52 = vmul.f32 %v2096_v1, %v1090_v31 }
  0xfd   : > { %v2906_v37 = vpop.xlane.xlu1 %291  ;;  %v872_v51 = vsel %vm870_vm1, %v871_v47, %v869_v33  ;;  %v663_v5 = vmul.f32 %v662_v27, %v2832_v3  ;;  %v766_v0 = vmul.f32 %v2098_v9, %v2880_v57  ;;  %vm678_vm11 = vcmp.eq.f32.partialorder %v2852_v46, 0.0 }
  0xfe   : > { %v290_v2 = vpop.xlane.xlu0 %289  ;;  %v674_v38 = vmul.f32 %v2094_v40, %v673_v25  ;;  %v962_v56 = vmul.f32 %v2092_v54, %v961_v58  ;;  %2099 = vrsqrt.f32 %v2904_v39  ;;  %v860_v55 = vsel %vm858_vm4, %v859_v63, %v857_v14 }
  0xff   : > { %v2911_v62 = vpop.xlane.xlu2 %305  ;;  %v665_v6 = vsel %vm664_vm5, %v2832_v3, %v663_v5  ;;  %v679_v53 = vand.u32 2147483648, %v2852_v46  ;;  %v767_v43 = vmul.f32 %v2098_v9, %v766_v0  ;;  %v1036_v31 = vadd.f32 1e-06, %v872_v51 }
 0x100   : > { %v953_v40 = vsel %vm952_vm2, %v2812_v10, %v951_v26  ;;  %v675_v47 = vmul.f32 %v674_v38, %v2852_v46  ;;  %v963_v54 = vmul.f32 %v962_v56, %v2834_v60  ;;  %v668_v45 = vsel %vm666_vm6, %v667_v4, %v665_v6 }
 0x101   : > { %v768_v63 = vmul.f32 0.5, %v767_v43  ;;  %v2941_v1 = vmul.f32 0.0078125, %v2845_v36  ;;  %v1877_v5 = vpack.c.bf16 %v1122_v52, %v2868_v59  ;;  %v1035_v33 = vadd.f32 1e-06, %v860_v55 }
 0x102   : > { %v677_v0 = vsel %vm676_vm8, %v2852_v46, %v675_v47  ;;  %v965_v13 = vsel %vm964_vm9, %v2834_v60, %v963_v54  ;;  %v2951_v56 = vmul.f32 0.0078125, %v2877_v61  ;;  %v956_v36 = vsel %vm954_vm7, %v955_v29, %v953_v40 }
 0x103   : > { %v680_v59 = vsel %vm678_vm11, %v679_v53, %v677_v0  ;;  %v967_v27 = vand.u32 2147483648, %v2834_v60  ;;  %v1101_v4 = vsub.f32 %v2583_v32, %v2941_v1  ;;  %1937 = vst [vmem:[#allocation2 + $0x50] sm:$0xff] %v1877_v5   ;;  %2101 = vrcp.f32 %v1036_v31 }
 0x104   : > { %v2100_v14 = vpop.eup %2099  ;;  %v1019_v61 = vadd.f32 1e-06, %v668_v45  ;;  %v769_v25 = vsub.f32 1.5, %v768_v63  ;;  %v2963_v58 = vmul.f32 0.0078125, %v2882_v30  ;;  %v1020_v52 = vadd.f32 1e-06, %v680_v59 }
 0x105   : > { %v418_v3 = vpop.xlane.xlu1 %417  ;;  %v968_v10 = vsel %vm966_vm10, %v967_v27, %v965_v13  ;;  %v754_v46 = vmul.f32 %v2100_v14, %v2904_v39  ;;  %v2968_v29 = vmul.f32 0.0078125, %v290_v2  ;;  %2103 = vrcp.f32 %v1035_v33 }
 0x106   : > { %v2953_v8 = vpop.xlane.xlu0 %307  ;;  %v770_v51 = vmul.f32 %v2098_v9, %v769_v25  ;;  %v493_v38 = vmul.f32 128.0, %v2941_v1  ;;  %v494_v55 = vmul.f32 128.0, %v2951_v56  ;;  %v1043_v6 = vadd.f32 1e-06, %v956_v36 }
 0x107   : > { %v420_v26 = vpop.xlane.xlu2 %419  ;;  %vm772_vm12 = vcmp.eq.f32.partialorder %v2880_v57, inf  ;;  %v755_v53 = vmul.f32 %v2100_v14, %v754_v46  ;;  %v2974_v30 = vmul.f32 0.0078125, %v2875_v11  ;;  %2105 = vrcp.f32 %v1019_v61 }
 0x108   : > { %v1044_v60 = vadd.f32 1e-06, %v968_v10  ;;  %v525_v43 = vmul.f32 %v493_v38, %v2941_v1  ;;  %v526_v2 = vmul.f32 %v494_v55, %v2951_v56  ;;  %2107 = vrcp.f32 %v1020_v52 }
 0x109   : > { %v756_v31 = vmul.f32 0.5, %v755_v53  ;;  %v502_v9 = vmul.f32 128.0, %v2963_v58  ;;  %v477_v40 = vmul.f32 128.0, %v2968_v29  ;;  %v2102_v47 = vpop.eup %2101  ;;  %v771_v54 = vmul.f32 %v770_v51, %v2880_v57 }
 0x10a   : > { %vm774_vm13 = vcmp.eq.f32.partialorder %v2880_v57, 0.0  ;;  %v1833_v45 = vld [vmem:[#allocation2 + $0x50] sm:$0xff]  ;;  %v557_v11 = vsub.f32 %v418_v3, %v525_v43  ;;  %v558_v63 = vsub.f32 %v420_v26, %v526_v2  ;;  %2109 = vrcp.f32 %v1043_v6 }
 0x10b   : > { %v775_v0 = vand.u32 2147483648, %v2880_v57  ;;  %v757_v13 = vsub.f32 1.5, %v756_v31  ;;  %v534_v36 = vmul.f32 %v502_v9, %v2963_v58  ;;  %v2104_v27 = vpop.eup %2103  ;;  %2111 = vrcp.f32 %v1044_v60  ;;  %1433 = vmatmul.bf16.vlgmr.msra.gmra.mxu1 %v1833_v45 }
 0x10c   : > { %vm760_vm14 = vcmp.eq.f32.partialorder %v2904_v39, inf  ;;  %v589_v61 = vmul.f32 0.007874016, %v557_v11  ;;  %v590_v25 = vmul.f32 0.007874016, %v558_v63  ;;  %v509_v3 = vmul.f32 %v477_v40, %v2968_v29 }
 0x10d   : > { %v436_v5 = vpop.xlane.xlu1 %435  ;;  %v758_v52 = vmul.f32 %v2100_v14, %v757_v13  ;;  %v501_v26 = vmul.f32 128.0, %v2974_v30  ;;  %v2106_v46 = vpop.eup %2105  ;;  %v1132_v51 = vmul.f32 %v2102_v47, %v1100_v28  ;;  %v773_v38 = vsel %vm772_vm12, %v2880_v57, %v771_v54 }
 0x10e   : > { %v434_v33 = vpop.xlane.xlu0 %433  ;;  %v566_v10 = vsub.f32 %v436_v5, %v534_v36  ;;  %v2993_v55 = vmax.f32 %v589_v61, 0.0  ;;  %v2995_v6 = vmax.f32 %v590_v25, 0.0  ;;  %v2108_v53 = vpop.eup %2107  ;;  %v1131_v14 = vmul.f32 %v2104_v27, %v1099_v7 }
 0x10f   : > { %v386_v59 = vpop.xlane.xlu2 %385  ;;  %v3001_v60 = vmul.f32 0.0078125, %v2911_v62  ;;  %vm762_vm15 = vcmp.eq.f32.partialorder %v2904_v39, 0.0  ;;  %v3005_v17 = vmul.f32 0.0078125, %v2906_v37  ;;  %v3009_v44 = vmul.f32 0.0078125, %v2953_v8 }
 0x110   : > { %v598_v43 = vmul.f32 0.007874016, %v566_v10  ;;  %v541_v2 = vsub.f32 %v386_v59, %v509_v3  ;;  %2113 = vrsqrt.f32 %v2993_v55  ;;  %v2110_v28 = vpop.eup %2109  ;;  %v776_v16 = vsel %vm774_vm13, %v775_v0, %v773_v38 }
 0x111   : > { %v759_v35 = vmul.f32 %v758_v52, %v2904_v39  ;;  %2115 = vrsqrt.f32 %v2995_v6  ;;  %v533_v7 = vmul.f32 %v501_v26, %v2974_v30  ;;  %v2112_v62 = vpop.eup %2111  ;;  %v1115_v37 = vmul.f32 %v2106_v46, %v1083_v48 }
 0x112   : > { %v1116_v8 = vmul.f32 %v2108_v53, %v1084_v15  ;;  %v3022_v31 = vmax.f32 %v598_v43, 0.0  ;;  %v573_v57 = vmul.f32 0.007874016, %v541_v2  ;;  %v763_v47 = vand.u32 2147483648, %v2904_v39 }
 0x113   : > { %v565_v54 = vsub.f32 %v434_v33, %v533_v7  ;;  %v1902_v45 = vpack.c.bf16 %v1132_v51, %v1131_v14  ;;  %v485_v11 = vmul.f32 128.0, %v3001_v60  ;;  %v1028_v5 = vadd.f32 1e-06, %v776_v16 }
 0x114   : > { %v1109_v22 = vsub.f32 %v3029_v20, %v2974_v30  ;;  %v1110_v24 = vsub.f32 %v3034_v42, %v2963_v58  ;;  %2117 = vrsqrt.f32 %v3022_v31  ;;  %v1140_v48 = vmul.f32 %v2112_v62, %v1108_v50  ;;  %v3054_v50 = vld [vmem:[%s2476_s19 + $0xa8] sm:$0xff]  ;;  %v2184_v30 = vld [vmem:[%s2476_s19 + $0x60] sm:$0xff] }
 0x115   : > { %v402_v9 = vpop.xlane.xlu1 %401  ;;  %v761_v15 = vsel %vm760_vm14, %v2904_v39, %v759_v35  ;;  %v3045_v33 = vmax.f32 %v573_v57, 0.0  ;;  %v597_v0 = vmul.f32 0.007874016, %v565_v54  ;;  %1942 = vst [vmem:[#allocation2 + $0x20] sm:$0xff] %v1902_v45   ;;  %v517_v36 = vmul.f32 %v485_v11, %v3001_v60 }
 0x116   : > { %v3024_v40 = vpop.xlane.xlu0 %387  ;;  %v2114_v13 = vpop.eup %2113  ;;  %v486_v59 = vmul.f32 128.0, %v3009_v44  ;;  %v478_v27 = vmul.f32 128.0, %v3005_v17  ;;  %v1862_v61 = vpack.c.bf16 %v1116_v8, %v1115_v37  ;;  %v3503_v18 = vsub.f32 %v2546_v19, %v2770_v49 }
 0x117   : > { %v404_v63 = vpop.xlane.xlu2 %403  ;;  %v2116_v25 = vpop.eup %2115  ;;  %v1102_v52 = vsub.f32 %v3054_v50, %v2951_v56  ;;  %v874_v10 = vmul.f32 %v2114_v13, %v2993_v55  ;;  %2119 = vrsqrt.f32 %v3045_v33  ;;  %v3061_v26 = vmax.f32 %v597_v0, 0.0 }
 0x118   : > { %v1139_v34 = vmul.f32 %v2110_v28, %v3503_v18  ;;  %2121 = vrcp.f32 %v1028_v5  ;;  %v886_v3 = vmul.f32 %v2116_v25, %v2995_v6  ;;  %v549_v46 = vsub.f32 %v402_v9, %v517_v36  ;;  %1934 = vst [vmem:[#allocation2] sm:$0xff] %v1862_v61  }
 0x119   : > { %v764_v19 = vsel %vm762_vm15, %v763_v47, %v761_v15  ;;  %v875_v49 = vmul.f32 %v2114_v13, %v874_v10  ;;  %v883_v51 = vand.u32 2147483648, %v2993_v55  ;;  %vm880_vm0 = vcmp.eq.f32.partialorder %v2993_v55, inf }
 0x11a   : > { %v1922_v38 = vpack.c.bf16 %v1140_v48, %v1139_v34  ;;  %v2118_v53 = vpop.eup %2117  ;;  %v887_v14 = vmul.f32 %v2116_v25, %v886_v3  ;;  %2123 = vrsqrt.f32 %v3061_v26  ;;  %v518_v43 = vmul.f32 %v486_v59, %v3009_v44 }
 0x11b   : > { %v510_v2 = vmul.f32 %v478_v27, %v3005_v17  ;;  %v876_v39 = vmul.f32 0.5, %v875_v49  ;;  %vm882_vm1 = vcmp.eq.f32.partialorder %v2993_v55, 0.0  ;;  %vm892_vm2 = vcmp.eq.f32.partialorder %v2995_v6, inf }
 0x11c   : > { %v982_v35 = vmul.f32 %v2118_v53, %v3022_v31  ;;  %v581_v7 = vmul.f32 0.007874016, %v549_v46  ;;  %1946 = vst [vmem:[#allocation2 + $0x70] sm:$0xff] %v1922_v38   ;;  %v1027_v37 = vadd.f32 1e-06, %v764_v19  ;;  %v888_v8 = vmul.f32 0.5, %v887_v14 }
 0x11d   : > { %v3070_v28 = vpop.xlane.xlu1 %327  ;;  %v1838_v57 = vld [vmem:[#allocation2 + $0x20] sm:$0xff]  ;;  %v550_v9 = vsub.f32 %v404_v63, %v518_v43  ;;  %v542_v47 = vsub.f32 %v3024_v40, %v510_v2  ;;  %v2120_v54 = vpop.eup %2119  ;;  %v877_v45 = vsub.f32 1.5, %v876_v39  ;;  %vm894_vm3 = vcmp.eq.f32.partialorder %v2995_v6, 0.0 }
 0x11e   : > { %v3072_v16 = vpop.xlane.xlu0 %325  ;;  %v983_v11 = vmul.f32 %v2118_v53, %v982_v35  ;;  %v3081_v5 = vmax.f32 %v581_v7, 0.0  ;;  %v2122_v48 = vpop.eup %2121  ;;  %v889_v15 = vsub.f32 1.5, %v888_v8  ;;  %v895_v0 = vand.u32 2147483648, %v2995_v6  ;;  %1458 = vmatmul.bf16.gmra.mxu2 %v1838_v57 }
 0x11f   : > { %v3077_v62 = vpop.xlane.xlu2 %341  ;;  %v682_v36 = vmul.f32 %v2120_v54, %v3045_v33  ;;  %v582_v59 = vmul.f32 0.007874016, %v550_v9  ;;  %v878_v27 = vmul.f32 %v2114_v13, %v877_v45  ;;  %vm988_vm4 = vcmp.eq.f32.partialorder %v3022_v31, inf  ;;  %v1830_v40 = vld [vmem:[#allocation2] sm:$0xff] }
 0x120   : > { %v984_v61 = vmul.f32 0.5, %v983_v11  ;;  %2125 = vrsqrt.f32 %v3081_v5  ;;  %v2124_v63 = vpop.eup %2123  ;;  %v890_v18 = vmul.f32 %v2116_v25, %v889_v15  ;;  %v574_v10 = vmul.f32 0.007874016, %v542_v47  ;;  %1418 = vmatmul.bf16.gmra.mxu0 %v1830_v40 }
 0x121   : > { %2127 = vrcp.f32 %v1027_v37  ;;  %v683_v34 = vmul.f32 %v2120_v54, %v682_v36  ;;  %v879_v3 = vmul.f32 %v878_v27, %v2993_v55  ;;  %v970_v19 = vmul.f32 %v2124_v63, %v3061_v26 }
 0x122   : > { %v985_v46 = vsub.f32 1.5, %v984_v61  ;;  %v3089_v49 = vmax.f32 %v582_v59, 0.0  ;;  %v891_v13 = vmul.f32 %v890_v18, %v2995_v6  ;;  %vm990_vm5 = vcmp.eq.f32.partialorder %v3022_v31, 0.0 }
 0x123   : > { %v991_v38 = vand.u32 2147483648, %v3022_v31  ;;  %v684_v14 = vmul.f32 0.5, %v683_v34  ;;  %v1842_v43 = vld [vmem:[#allocation2 + $0x70] sm:$0xff]  ;;  %v881_v39 = vsel %vm880_vm0, %v2993_v55, %v879_v3  ;;  %v971_v7 = vmul.f32 %v2124_v63, %v970_v19 }
 0x124   : > { %v986_v35 = vmul.f32 %v2118_v53, %v985_v46  ;;  %2129 = vrsqrt.f32 %v3089_v49  ;;  %v3504_v8 = vsub.f32 %v2561_v23, %v2810_v41  ;;  %v884_v9 = vsel %vm882_vm1, %v883_v51, %v881_v39  ;;  %1478 = vmatmul.bf16.gmra.mxu3 %v1842_v43 }
 0x125   : > { %v3094_v2 = vpop.xlane.xlu1 %293  ;;  %v893_v47 = vsel %vm892_vm2, %v2995_v6, %v891_v13  ;;  %v685_v45 = vsub.f32 1.5, %v684_v14  ;;  %v972_v36 = vmul.f32 0.5, %v971_v7  ;;  %v3115_v59 = vmax.f32 %v574_v10, 0.0 }
 0x126   : > { %v3096_v25 = vpop.xlane.xlu0 %343  ;;  %v1124_v57 = vmul.f32 %v2122_v48, %v3504_v8  ;;  %v2126_v11 = vpop.eup %2125  ;;  %v896_v53 = vsel %vm894_vm3, %v895_v0, %v893_v47  ;;  %v987_v15 = vmul.f32 %v986_v35, %v3022_v31  ;;  %vm688_vm6 = vcmp.eq.f32.partialorder %v3045_v33, inf }
 0x127   : > { %v3102_v37 = vpop.xlane.xlu2 %295  ;;  %v2128_v23 = vpop.eup %2127  ;;  %v686_v41 = vmul.f32 %v2120_v54, %v685_v45  ;;  %vm690_vm7 = vcmp.eq.f32.partialorder %v3045_v33, 0.0  ;;  %v778_v55 = vmul.f32 %v2126_v11, %v3081_v5  ;;  %v1037_v51 = vadd.f32 1e-06, %v884_v9 }
 0x128   : > { %v989_v48 = vsel %vm988_vm4, %v3022_v31, %v987_v15  ;;  %v691_v6 = vand.u32 2147483648, %v3045_v33  ;;  %v973_v0 = vsub.f32 1.5, %v972_v36  ;;  %v1038_v27 = vadd.f32 1e-06, %v896_v53 }
 0x129   : > { %v992_v61 = vsel %vm990_vm5, %v991_v38, %v989_v48  ;;  %v687_v54 = vmul.f32 %v686_v41, %v3045_v33  ;;  %v779_v40 = vmul.f32 %v2126_v11, %v778_v55  ;;  %v3505_v34 = vsub.f32 %v2555_v21, %v2826_v12 }
 0x12a   : > { %v2130_v18 = vpop.eup %2129  ;;  %v974_v3 = vmul.f32 %v2124_v63, %v973_v0  ;;  %vm976_vm8 = vcmp.eq.f32.partialorder %v3061_v26, inf  ;;  %2131 = vrsqrt.f32 %v3115_v59  ;;  %vm978_vm9 = vcmp.eq.f32.partialorder %v3061_v26, 0.0 }
 0x12b   : > { %v1123_v10 = vmul.f32 %v2128_v23, %v3505_v34  ;;  %v979_v46 = vand.u32 2147483648, %v3061_v26  ;;  %v780_v19 = vmul.f32 0.5, %v779_v40  ;;  %v790_v31 = vmul.f32 %v2130_v18, %v3089_v49 }
 0x12c   : > { %2133 = vrcp.f32 %v1037_v51  ;;  %v1046_v38 = vadd.f32 1e-06, %v992_v61  ;;  %v689_v21 = vsel %vm688_vm6, %v3045_v33, %v687_v54  ;;  %v975_v12 = vmul.f32 %v974_v3, %v3061_v26 }
 0x12d   : > { %v3135_v13 = vpop.xlane.xlu1 %311  ;;  %2135 = vrcp.f32 %v1038_v27  ;;  %v781_v14 = vsub.f32 1.5, %v780_v19  ;;  %v791_v43 = vmul.f32 %v2130_v18, %v790_v31  ;;  %v3144_v39 = vmul.f32 0.0078125, %v3070_v28 }
 0x12e   : > { %v3141_v63 = vpop.xlane.xlu0 %309  ;;  %v977_v7 = vsel %vm976_vm8, %v3061_v26, %v975_v12  ;;  %vm784_vm10 = vcmp.eq.f32.partialorder %v3081_v5, inf  ;;  %vm786_vm11 = vcmp.eq.f32.partialorder %v3081_v5, 0.0  ;;  %v1882_v8 = vpack.c.bf16 %v1124_v57, %v1123_v10 }
 0x12f   : > { %v3146_v35 = vpop.xlane.xlu2 %421  ;;  %v692_v9 = vsel %vm690_vm7, %v691_v6, %v689_v21  ;;  %v980_v47 = vsel %vm978_vm9, %v979_v46, %v977_v7  ;;  %v782_v45 = vmul.f32 %v2126_v11, %v781_v14  ;;  %v787_v28 = vand.u32 2147483648, %v3081_v5 }
 0x130   : > { %v2132_v53 = vpop.eup %2131  ;;  %2137 = vrcp.f32 %v1046_v38  ;;  %v1045_v15 = vadd.f32 1e-06, %v980_v47  ;;  %v792_v36 = vmul.f32 0.5, %v791_v43  ;;  %vm796_vm12 = vcmp.eq.f32.partialorder %v3089_v49, inf  ;;  %1938 = vst [vmem:[#allocation2 + $0x68] sm:$0xff] %v1882_v8  }
 0x131   : > { %v783_v23 = vmul.f32 %v782_v45, %v3081_v5  ;;  %vm798_vm13 = vcmp.eq.f32.partialorder %v3089_v49, 0.0  ;;  %v694_v33 = vmul.f32 %v2132_v53, %v3115_v59  ;;  %v3163_v57 = vmul.f32 0.0078125, %v3072_v16 }
 0x132   : > { %v2134_v26 = vpop.eup %2133  ;;  %v1021_v11 = vadd.f32 1e-06, %v692_v9  ;;  %v793_v41 = vsub.f32 1.5, %v792_v36  ;;  %v799_v55 = vand.u32 2147483648, %v3089_v49  ;;  %v3167_v51 = vmul.f32 0.0078125, %v3077_v62 }
 0x133   : > { %v2136_v48 = vpop.eup %2135  ;;  %v785_v6 = vsel %vm784_vm10, %v3081_v5, %v783_v23  ;;  %v695_v0 = vmul.f32 %v2132_v53, %v694_v33  ;;  %v703_v27 = vand.u32 2147483648, %v3115_v59  ;;  %v3174_v61 = vmul.f32 0.0078125, %v3096_v25 }
 0x134   : > { %2139 = vrcp.f32 %v1045_v15  ;;  %v788_v16 = vsel %vm786_vm11, %v787_v28, %v785_v6  ;;  %v794_v54 = vmul.f32 %v2130_v18, %v793_v41  ;;  %vm700_vm14 = vcmp.eq.f32.partialorder %v3115_v59, inf }
 0x135   : > { %v3180_v62 = vmul.f32 0.0078125, %v3094_v2  ;;  %v1133_v40 = vmul.f32 %v2134_v26, %v1101_v4  ;;  %v1029_v34 = vadd.f32 1e-06, %v788_v16  ;;  %v696_v10 = vmul.f32 0.5, %v695_v0  ;;  %v438_v3 = vpop.xlane.xlu1 %437  ;;  %v2185_v0 = vld [vmem:[%s2476_s19 + $0x68] sm:$0xff] }
 0x136   : > { %vm702_vm15 = vcmp.eq.f32.partialorder %v3115_v59, 0.0  ;;  %v495_v25 = vmul.f32 128.0, %v3163_v57  ;;  %v2138_v46 = vpop.eup %2137  ;;  %v1134_v5 = vmul.f32 %v2136_v48, %v1102_v52  ;;  %2141 = vrcp.f32 %v1021_v11  ;;  %v424_v19 = vpop.xlane.xlu0 %423 }
 0x137   : > { %v795_v2 = vmul.f32 %v794_v54, %v3089_v49  ;;  %v503_v18 = vmul.f32 128.0, %v3167_v51  ;;  %v697_v32 = vsub.f32 1.5, %v696_v10  ;;  %v1834_v1 = vld [vmem:[#allocation2 + $0x68] sm:$0xff]  ;;  %v3193_v4 = vmul.f32 0.0078125, %v3102_v37  ;;  %v440_v38 = vpop.xlane.xlu2 %439 }
 0x138   : > { %v527_v31 = vmul.f32 %v495_v25, %v3163_v57  ;;  %v504_v21 = vmul.f32 128.0, %v3174_v61  ;;  %2143 = vrcp.f32 %v1029_v34  ;;  %v496_v52 = vmul.f32 128.0, %v3144_v39  ;;  %1438 = vmatmul.bf16.gmra.mxu1 %v1834_v1 }
 0x139   : > { %v797_v56 = vsel %vm796_vm12, %v3089_v49, %v795_v2  ;;  %v535_v50 = vmul.f32 %v503_v18, %v3167_v51  ;;  %v1142_v12 = vmul.f32 %v2138_v46, %v1110_v24  ;;  %v698_v14 = vmul.f32 %v2132_v53, %v697_v32 }
 0x13a   : > { %v800_v37 = vsel %vm798_vm13, %v799_v55, %v797_v56  ;;  %v559_v43 = vsub.f32 %v3146_v35, %v527_v31  ;;  %v2140_v7 = vpop.eup %2139  ;;  %v3209_v9 = vmul.f32 0.0078125, %v3141_v63  ;;  %v536_v45 = vmul.f32 %v504_v21, %v3174_v61 }
 0x13b   : > { %v1030_v8 = vadd.f32 1e-06, %v800_v37  ;;  %v567_v47 = vsub.f32 %v438_v3, %v535_v50  ;;  %v699_v28 = vmul.f32 %v698_v14, %v3115_v59  ;;  %v528_v58 = vmul.f32 %v496_v52, %v3144_v39  ;;  %v2187_v52 = vld [vmem:[%s2476_s19 + $0x20] sm:$0xff] }
 0x13c   : > { %v591_v15 = vmul.f32 0.007874016, %v559_v43  ;;  %v1907_v42 = vpack.c.bf16 %v1134_v5, %v1133_v40  ;;  %v3214_v24 = vpop.eup %2141  ;;  %v568_v35 = vsub.f32 %v440_v38, %v536_v45  ;;  %v480_v53 = vmul.f32 128.0, %v3193_v4  ;;  %v2186_v38 = vld [vmem:[%s2476_s19 + $0x28] sm:$0xff] }
 0x13d   : > { %2145 = vrcp.f32 %v1030_v8  ;;  %v599_v49 = vmul.f32 0.007874016, %v567_v47  ;;  %v1141_v63 = vmul.f32 %v2140_v7, %v1109_v22  ;;  %v701_v36 = vsel %vm700_vm14, %v3115_v59, %v699_v28  ;;  %v392_v6 = vpop.xlane.xlu1 %391 }
 0x13e   : > { %v3223_v23 = vmax.f32 %v591_v15, 0.0  ;;  %v560_v33 = vsub.f32 %v424_v19, %v528_v58  ;;  %1943 = vst [vmem:[#allocation2 + $0x10] sm:$0xff] %v1907_v42   ;;  %v2144_v26 = vpop.eup %2143  ;;  %v704_v11 = vsel %vm702_vm15, %v703_v27, %v701_v36  ;;  %v600_v55 = vmul.f32 0.007874016, %v568_v35  ;;  %v390_v27 = vpop.xlane.xlu0 %389 }
 0x13f   : > { %v3227_v41 = vmax.f32 %v599_v49, 0.0  ;;  %v487_v48 = vmul.f32 128.0, %v3209_v9  ;;  %v1093_v20 = vsub.f32 %v2184_v30, %v3001_v60  ;;  %v1022_v22 = vadd.f32 1e-06, %v704_v11  ;;  %v406_v10 = vpop.xlane.xlu2 %405 }
 0x140   : > { %2147 = vrsqrt.f32 %v3223_v23  ;;  %v1094_v16 = vsub.f32 %v2185_v0, %v3009_v44  ;;  %v512_v59 = vmul.f32 %v480_v53, %v3193_v4  ;;  %v3237_v40 = vmax.f32 %v600_v55, 0.0 }
 0x141   : > { %2149 = vrsqrt.f32 %v3227_v41  ;;  %v1125_v54 = vmul.f32 %v2144_v26, %v1093_v20  ;;  %v592_v34 = vmul.f32 0.007874016, %v560_v33  ;;  %v519_v3 = vmul.f32 %v487_v48, %v3209_v9 }
 0x142   : > { %2151 = vrcp.f32 %v1022_v22  ;;  %v544_v25 = vsub.f32 %v392_v6, %v512_v59  ;;  %v479_v46 = vmul.f32 128.0, %v3180_v62  ;;  %v1927_v44 = vpack.c.bf16 %v1142_v12, %v1141_v63 }
 0x143   : > { %v2146_v60 = vpop.eup %2145  ;;  %v3242_v2 = vmul.f32 0.0078125, %v3135_v13  ;;  %2153 = vrsqrt.f32 %v3237_v40  ;;  %v3245_v18 = vmax.f32 %v592_v34, 0.0  ;;  %v551_v1 = vsub.f32 %v406_v10, %v519_v3 }
 0x144   : > { %v1126_v5 = vmul.f32 %v2146_v60, %v1094_v16  ;;  %v576_v32 = vmul.f32 0.007874016, %v544_v25  ;;  %1947 = vst [vmem:[#allocation2 + $0x78] sm:$0xff] %v1927_v44   ;;  %v1086_v21 = vsub.f32 %v2186_v38, %v3005_v17  ;;  %v1085_v12 = vsub.f32 %v2187_v52, %v2968_v29 }
 0x145   : > { %v1839_v19 = vld [vmem:[#allocation2 + $0x10] sm:$0xff]  ;;  %2155 = vrsqrt.f32 %v3245_v18  ;;  %v511_v37 = vmul.f32 %v479_v46, %v3180_v62  ;;  %v583_v8 = vmul.f32 0.007874016, %v551_v1  ;;  %v488_v17 = vmul.f32 128.0, %v3242_v2 }
 0x146   : > { %v2148_v31 = vpop.eup %2147  ;;  %v1887_v56 = vpack.c.bf16 %v1126_v5, %v1125_v54  ;;  %1463 = vmatmul.bf16.gmra.mxu2 %v1839_v19  ;;  %v3255_v7 = vmax.f32 %v576_v32, 0.0  ;;  %v1117_v15 = vmul.f32 %v3214_v24, %v1085_v12  ;;  %vm904_vm0 = vcmp.eq.f32.partialorder %v3223_v23, inf  ;;  %v408_v53 = vpop.xlane.xlu0 %407 }
 0x147   : > { %v2150_v50 = vpop.eup %2149  ;;  %v898_v13 = vmul.f32 %v2148_v31, %v3223_v23  ;;  %v543_v28 = vsub.f32 %v390_v27, %v511_v37  ;;  %vm906_vm1 = vcmp.eq.f32.partialorder %v3223_v23, 0.0  ;;  %v3263_v35 = vmax.f32 %v583_v8, 0.0 }
 0x148   : > { %v2152_v14 = vpop.eup %2151  ;;  %v994_v43 = vmul.f32 %v2150_v50, %v3227_v41  ;;  %1939 = vst [vmem:[#allocation2 + $0x8] sm:$0xff] %v1887_v56   ;;  %2157 = vrsqrt.f32 %v3255_v7  ;;  %v520_v26 = vmul.f32 %v488_v17, %v3242_v2  ;;  %v907_v48 = vand.u32 2147483648, %v3223_v23 }
 0x149   : > { %v1118_v47 = vmul.f32 %v2152_v14, %v1086_v21  ;;  %v899_v45 = vmul.f32 %v2148_v31, %v898_v13  ;;  %v2154_v29 = vpop.eup %2153  ;;  %v575_v36 = vmul.f32 0.007874016, %v543_v28  ;;  %2159 = vrsqrt.f32 %v3263_v35 }
 0x14a   : > { %v995_v58 = vmul.f32 %v2150_v50, %v994_v43  ;;  %v1006_v49 = vmul.f32 %v2154_v29, %v3237_v40  ;;  %vm1000_vm2 = vcmp.eq.f32.partialorder %v3227_v41, inf  ;;  %v552_v6 = vsub.f32 %v408_v53, %v520_v26 }
 0x14b   : > { %v900_v42 = vmul.f32 0.5, %v899_v45  ;;  %v1843_v33 = vld [vmem:[#allocation2 + $0x78] sm:$0xff]  ;;  %v1867_v11 = vpack.c.bf16 %v1118_v47, %v1117_v15  ;;  %v2156_v24 = vpop.eup %2155  ;;  %vm1002_vm3 = vcmp.eq.f32.partialorder %v3227_v41, 0.0  ;;  %v3271_v59 = vmax.f32 %v575_v36, 0.0 }
 0x14c   : > { %v996_v63 = vmul.f32 0.5, %v995_v58  ;;  %v1007_v30 = vmul.f32 %v2154_v29, %v1006_v49  ;;  %v910_v22 = vmul.f32 %v2156_v24, %v3245_v18  ;;  %1483 = vmatmul.bf16.gmra.mxu3 %v1843_v33  ;;  %v1003_v10 = vand.u32 2147483648, %v3227_v41 }
 0x14d   : > { %v901_v55 = vsub.f32 1.5, %v900_v42  ;;  %1935 = vst [vmem:[#allocation2 + $0x58] sm:$0xff] %v1867_v11   ;;  %vm1012_vm4 = vcmp.eq.f32.partialorder %v3237_v40, inf  ;;  %2161 = vrsqrt.f32 %v3271_v59  ;;  %vm1014_vm5 = vcmp.eq.f32.partialorder %v3237_v40, 0.0 }
 0x14e   : > { %v997_v20 = vsub.f32 1.5, %v996_v63  ;;  %v1008_v16 = vmul.f32 0.5, %v1007_v30  ;;  %v2158_v54 = vpop.eup %2157  ;;  %v911_v60 = vmul.f32 %v2156_v24, %v910_v22  ;;  %v584_v19 = vmul.f32 0.007874016, %v552_v6  ;;  %v2188_v6 = vld [vmem:[%s2476_s19 + $0xf0] sm:$0xff] }
 0x14f   : > { %v902_v0 = vmul.f32 %v2148_v31, %v901_v55  ;;  %v1835_v27 = vld [vmem:[#allocation2 + $0x8] sm:$0xff]  ;;  %v718_v46 = vmul.f32 %v2158_v54, %v3255_v7  ;;  %v2160_v32 = vpop.eup %2159  ;;  %v1015_v38 = vand.u32 2147483648, %v3237_v40  ;;  %vm916_vm6 = vcmp.eq.f32.partialorder %v3245_v18, inf }
 0x150   : > { %v998_v34 = vmul.f32 %v2150_v50, %v997_v20  ;;  %v1009_v3 = vsub.f32 1.5, %v1008_v16  ;;  %1443 = vmatmul.bf16.gmra.mxu1 %v1835_v27  ;;  %v912_v5 = vmul.f32 0.5, %v911_v60  ;;  %v802_v12 = vmul.f32 %v2160_v32, %v3263_v35 }
 0x151   : > { %v903_v25 = vmul.f32 %v902_v0, %v3223_v23  ;;  %v719_v21 = vmul.f32 %v2158_v54, %v718_v46  ;;  %v3294_v47 = vmax.f32 %v584_v19, 0.0  ;;  %vm918_vm7 = vcmp.eq.f32.partialorder %v3245_v18, 0.0 }
 0x152   : > { %v999_v44 = vmul.f32 %v998_v34, %v3227_v41  ;;  %v1010_v31 = vmul.f32 %v2154_v29, %v1009_v3  ;;  %v913_v52 = vsub.f32 1.5, %v912_v5  ;;  %vm724_vm8 = vcmp.eq.f32.partialorder %v3255_v7, inf  ;;  %v2189_v34 = vld [vmem:[%s2476_s19 + $0xf8] sm:$0xff] }
 0x153   : > { %v905_v1 = vsel %vm904_vm0, %v3223_v23, %v903_v25  ;;  %v720_v14 = vmul.f32 0.5, %v719_v21  ;;  %v803_v23 = vmul.f32 %v2160_v32, %v802_v12  ;;  %v2162_v45 = vpop.eup %2161  ;;  %vm726_vm9 = vcmp.eq.f32.partialorder %v3255_v7, 0.0 }
 0x154   : > { %v908_v56 = vsel %vm906_vm1, %v907_v48, %v905_v1  ;;  %v1001_v50 = vsel %vm1000_vm2, %v3227_v41, %v999_v44  ;;  %v1011_v37 = vmul.f32 %v1010_v31, %v3237_v40  ;;  %v1831_v43 = vld [vmem:[#allocation2 + $0x58] sm:$0xff]  ;;  %v914_v17 = vmul.f32 %v2156_v24, %v913_v52 }
 0x155   : > { %v1004_v13 = vsel %vm1002_vm3, %v1003_v10, %v1001_v50  ;;  %v1039_v28 = vadd.f32 1e-06, %v908_v56  ;;  %v919_v41 = vand.u32 2147483648, %v3245_v18  ;;  %v721_v15 = vsub.f32 1.5, %v720_v14  ;;  %1423 = vmatmul.bf16.gmra.mxu0 %v1831_v43 }
 0x156   : > { %v1047_v8 = vadd.f32 1e-06, %v1004_v13  ;;  %v1013_v29 = vsel %vm1012_vm4, %v3237_v40, %v1011_v37  ;;  %v915_v42 = vmul.f32 %v914_v17, %v3245_v18  ;;  %v804_v49 = vmul.f32 0.5, %v803_v23 }
 0x157   : > { %v1016_v58 = vsel %vm1014_vm5, %v1015_v38, %v1013_v29  ;;  %v722_v63 = vmul.f32 %v2158_v54, %v721_v15  ;;  %v706_v36 = vmul.f32 %v2162_v45, %v3271_v59  ;;  %v727_v48 = vand.u32 2147483648, %v3255_v7  ;;  %v2192_v15 = vld [vmem:[%s2476_s19 + $0x38] sm:$0xff] }
 0x158   : > { %2163 = vrcp.f32 %v1047_v8  ;;  %v1048_v53 = vadd.f32 1e-06, %v1016_v58  ;;  %v917_v33 = vsel %vm916_vm6, %v3245_v18, %v915_v42  ;;  %v805_v40 = vsub.f32 1.5, %v804_v49 }
 0x159   : > { %2165 = vrsqrt.f32 %v3294_v47  ;;  %v920_v26 = vsel %vm918_vm7, %v919_v41, %v917_v33  ;;  %v723_v11 = vmul.f32 %v722_v63, %v3255_v7  ;;  %v707_v24 = vmul.f32 %v2162_v45, %v706_v36  ;;  %v2193_v63 = vld [vmem:[%s2476_s19 + $0x30] sm:$0xff] }
 0x15a   : > { %2167 = vrcp.f32 %v1048_v53  ;;  %v1040_v55 = vadd.f32 1e-06, %v920_v26  ;;  %v806_v30 = vmul.f32 %v2160_v32, %v805_v40  ;;  %v1111_v0 = vsub.f32 %v2188_v6, %v3167_v51  ;;  %v2191_v32 = vld [vmem:[%s2476_s19 + $0xb0] sm:$0xff]  ;;  %v3343_v53 = vld [vmem:[%s3492_s2] ss:$0 sm:$0xff] }
 0x15b   : > { %2169 = vrcp.f32 %v1039_v28  ;;  %v725_v20 = vsel %vm724_vm8, %v3255_v7, %v723_v11  ;;  %v708_v18 = vmul.f32 0.5, %v707_v24  ;;  %v1112_v10 = vsub.f32 %v2189_v34, %v3174_v61  ;;  %v2190_v7 = vld [vmem:[%s2476_s19 + $0xb8] sm:$0xff]  ;;  %v1510_v24 = vld [vmem:[%s2476_s19 + $0x80] sm:$0xff] }
 0x15c   : > { %2171 = vrcp.f32 %v1040_v55  ;;  %v728_v16 = vsel %vm726_vm9, %v727_v48, %v725_v20  ;;  %v807_v25 = vmul.f32 %v806_v30, %v3263_v35  ;;  %v1104_v44 = vsub.f32 %v2190_v7, %v3144_v39  ;;  %v1518_v30 = vld [vmem:[%s2476_s19 + $0xc0] sm:$0xff] }
 0x15d   : > { %v709_v54 = vsub.f32 1.5, %v708_v18  ;;  %v1024_v5 = vadd.f32 1e-06, %v728_v16  ;;  %v1103_v1 = vsub.f32 %v2191_v32, %v3163_v57  ;;  %vm808_vm10 = vcmp.eq.f32.partialorder %v3263_v35, inf  ;;  %v1494_v6 = vld [vmem:[%s2476_s19] sm:$0xff] }
 0x15e   : > { %v2164_v22 = vpop.eup %2163  ;;  %v811_v61 = vand.u32 2147483648, %v3263_v35  ;;  %vm712_vm11 = vcmp.eq.f32.partialorder %v3271_v59, inf  ;;  %vm714_vm12 = vcmp.eq.f32.partialorder %v3271_v59, 0.0  ;;  %v809_v39 = vsel %vm808_vm10, %v3263_v35, %v807_v25 }
 0x15f   : > { %v2166_v27 = vpop.eup %2165  ;;  %v1143_v60 = vmul.f32 %v2164_v22, %v1111_v0  ;;  %v710_v19 = vmul.f32 %v2162_v45, %v709_v54  ;;  %v715_v50 = vand.u32 2147483648, %v3271_v59  ;;  %2173 = vrcp.f32 %v1024_v5  ;;  %v2194_v54 = vld [vmem:[%s2476_s19 + $0x78] sm:$0xff] }
 0x160   : > { %v814_v3 = vmul.f32 %v2166_v27, %v3294_v47  ;;  %v2168_v46 = vpop.eup %2167  ;;  %vm810_vm13 = vcmp.eq.f32.partialorder %v3263_v35, 0.0  ;;  %vm820_vm14 = vcmp.eq.f32.partialorder %v3294_v47, inf  ;;  %v1088_v35 = vsub.f32 %v2192_v15, %v3193_v4 }
 0x161   : > { %v2170_v51 = vpop.eup %2169  ;;  %v1144_v31 = vmul.f32 %v2168_v46, %v1112_v10  ;;  %v711_v21 = vmul.f32 %v710_v19, %v3271_v59  ;;  %v812_v8 = vsel %vm810_vm13, %v811_v61, %v809_v39  ;;  %vm822_vm15 = vcmp.eq.f32.partialorder %v3294_v47, 0.0  ;;  %v2195_v10 = vld [vmem:[%s2476_s19 + $0x70] sm:$0xff]  ;;  %v1519_v19 = vld [vmem:[%s2476_s19 + $0xc8] sm:$0xff] }
 0x162   : > { %v815_v38 = vmul.f32 %v2166_v27, %v814_v3  ;;  %v2172_v56 = vpop.eup %2171  ;;  %v1135_v57 = vmul.f32 %v2170_v51, %v1103_v1  ;;  %v1031_v28 = vadd.f32 1e-06, %v812_v8  ;;  %v1087_v36 = vsub.f32 %v2193_v63, %v3180_v62  ;;  %v1495_v61 = vld [vmem:[%s2476_s19 + $0x8] sm:$0xff] }
 0x163   : > { %v1932_v12 = vpack.c.bf16 %v1144_v31, %v1143_v60  ;;  %v1136_v13 = vmul.f32 %v2172_v56, %v1104_v44  ;;  %v713_v37 = vsel %vm712_vm11, %v3271_v59, %v711_v21  ;;  %v823_v59 = vand.u32 2147483648, %v3294_v47 }
 0x164   : > { %v816_v52 = vmul.f32 0.5, %v815_v38  ;;  %v716_v14 = vsel %vm714_vm12, %v715_v50, %v713_v37  ;;  %v1096_v34 = vsub.f32 %v2194_v54, %v3242_v2  ;;  %v1095_v60 = vsub.f32 %v2195_v10, %v3209_v9  ;;  %v1511_v2 = vld [vmem:[%s2476_s19 + $0x88] sm:$0xff] }
 0x165   : > { %1948 = vst [vmem:[#allocation2 + $0x28] sm:$0xff] %v1932_v12   ;;  %v1023_v17 = vadd.f32 1e-06, %v716_v14  ;;  %v1912_v23 = vpack.c.bf16 %v1136_v13, %v1135_v57  ;;  %v2174_v41 = vpop.eup %2173  ;;  %v1502_v12 = vld [vmem:[%s2476_s19 + $0x40] sm:$0xff]  ;;  %v1503_v14 = vld [vmem:[%s2476_s19 + $0x48] sm:$0xff] }
 0x166   : > { %v817_v43 = vsub.f32 1.5, %v816_v52  ;;  %v1120_v33 = vmul.f32 %v2174_v41, %v1088_v35 }
 0x167   : > { %2175 = vrcp.f32 %v1023_v17  ;;  %1944 = vst [vmem:[#allocation2 + $0x38] sm:$0xff] %v1912_v23   ;;  %v1496_v23 = vld [vmem:[%s2476_s19 + $0x10] sm:$0xff] }
 0x168   : > { %v818_v45 = vmul.f32 %v2166_v27, %v817_v43  ;;  %2177 = vrcp.f32 %v1031_v28 }
 0x16a   : > { %v819_v29 = vmul.f32 %v818_v45, %v3294_v47 }
 0x16c   : > { %v821_v58 = vsel %vm820_vm14, %v3294_v47, %v819_v29  ;;  %v1844_v49 = vld [vmem:[#allocation2 + $0x28] sm:$0xff]  ;;  %v1454_v11 = vpop.f32.mrf.mxu2  ;;  %v1512_v29 = vld [vmem:[%s2476_s19 + $0x90] sm:$0xff] }
 0x16d   : > { %v824_v42 = vsel %vm822_vm15, %v823_v59, %v821_v58  ;;  %v2176_v4 = vpop.eup %2175  ;;  %1488 = vmatmul.bf16.gmra.mxu3 %v1844_v49  ;;  %v1455_v55 = vadd.f32 %v3343_v53, %v1454_v11  ;;  %v1497_v58 = vld [vmem:[%s2476_s19 + $0x18] sm:$0xff]  ;;  %v1520_v49 = vld [vmem:[%s2476_s19 + $0xd0] sm:$0xff] }
 0x16e   : > { %v1032_v40 = vadd.f32 1e-06, %v824_v42  ;;  %v1119_v26 = vmul.f32 %v2176_v4, %v1087_v36  ;;  %v1840_v47 = vld [vmem:[#allocation2 + $0x38] sm:$0xff]  ;;  %v1474_v48 = vpop.f32.mrf.mxu3  ;;  %v2178_v0 = vpop.eup %2177 }
 0x16f   : > { %1468 = vmatmul.bf16.gmra.mxu2 %v1840_v47  ;;  %v1475_v62 = vadd.f32 %v3343_v53, %v1474_v48  ;;  %v1542_v18 = vadd.f32 %v1510_v24, %v1455_v55  ;;  %v1127_v46 = vmul.f32 %v2178_v0, %v1095_v60  ;;  %v1521_v55 = vld [vmem:[%s2476_s19 + $0xd8] sm:$0xff] }
 0x170   : > { %2179 = vrcp.f32 %v1032_v40  ;;  %v1872_v20 = vpack.c.bf16 %v1120_v33, %v1119_v26  ;;  %v1414_v22 = vpop.f32.mrf.mxu0  ;;  %v1513_v40 = vld [vmem:[%s2476_s19 + $0x98] sm:$0xff] }
 0x171   : > { %v1550_v16 = vadd.f32 %v1518_v30, %v1475_v62  ;;  %v1415_v27 = vadd.f32 %v3343_v53, %v1414_v22  ;;  %1574 = vst [vmem:[%s3359_s22 + $0x80] sm:$0xff] %v1542_v18  ;;  %v1505_v0 = vld [vmem:[%s2476_s19 + $0x58] sm:$0xff] }
 0x172   : > { %1936 = vst [vmem:[#allocation2 + $0x18] sm:$0xff] %v1872_v20   ;;  %v1504_v20 = vld [vmem:[%s2476_s19 + $0x50] sm:$0xff] }
 0x173   : > { %1582 = vst [vmem:[%s3359_s22 + $0xc0] sm:$0xff] %v1550_v16  ;;  %v1526_v3 = vadd.f32 %v1494_v6, %v1415_v27 }
 0x174   : > { %v1456_v44 = vpop.f32.mrf.mxu2 }
 0x175   : > { %1558 = vst [vmem:[%s3359_s22] sm:$0xff] %v1526_v3  ;;  %v1457_v9 = vadd.f32 %v3343_v53, %v1456_v44  ;;  %v1506_v3 = vld [vmem:[%s2476_s19 + $0x60] sm:$0xff] }
 0x176   : > { %v2180_v25 = vpop.eup %2179  ;;  %v1476_v5 = vpop.f32.mrf.mxu3  ;;  %v1522_v44 = vld [vmem:[%s2476_s19 + $0xe0] sm:$0xff] }
 0x177   : > { %v1128_v7 = vmul.f32 %v2180_v25, %v1096_v34  ;;  %v1477_v32 = vadd.f32 %v3343_v53, %v1476_v5  ;;  %v1543_v31 = vadd.f32 %v1511_v2, %v1457_v9  ;;  %v1514_v34 = vld [vmem:[%s2476_s19 + $0xa0] sm:$0xff]  ;;  %v1515_v5 = vld [vmem:[%s2476_s19 + $0xa8] sm:$0xff] }
 0x178   : > { %v1416_v38 = vpop.f32.mrf.mxu0 }
 0x179   : > { %v1892_v51 = vpack.c.bf16 %v1128_v7, %v1127_v46  ;;  %v1832_v1 = vld [vmem:[#allocation2 + $0x18] sm:$0xff]  ;;  %v1551_v21 = vadd.f32 %v1519_v19, %v1477_v32  ;;  %v1417_v56 = vadd.f32 %v3343_v53, %v1416_v38  ;;  %1575 = vst [vmem:[%s3359_s22 + $0x88] sm:$0xff] %v1543_v31  ;;  %v1498_v31 = vld [vmem:[%s2476_s19 + $0x20] sm:$0xff] }
 0x17a   : > { %1428 = vmatmul.bf16.gmra.mxu0 %v1832_v1 }
 0x17b   : > { %1940 = vst [vmem:[#allocation2 + $0x48] sm:$0xff] %v1892_v51   ;;  %v1527_v39 = vadd.f32 %v1495_v61, %v1417_v56  ;;  %v1507_v56 = vld [vmem:[%s2476_s19 + $0x68] sm:$0xff] }
 0x17c   : > { %1583 = vst [vmem:[%s3359_s22 + $0xc8] sm:$0xff] %v1551_v21 }
 0x17d   : > { %1559 = vst [vmem:[%s3359_s22 + $0x8] sm:$0xff] %v1527_v39 }
 0x182   : > { %v1836_v50 = vld [vmem:[#allocation2 + $0x48] sm:$0xff] }
 0x183   : > { %1448 = vmatmul.bf16.gmra.mxu1 %v1836_v50 }
 0x188   : > { %v1434_v52 = vpop.f32.mrf.mxu1 }
 0x189   : > { %v1435_v57 = vadd.f32 %v3343_v53, %v1434_v52 }
 0x18b   : > { %v1534_v13 = vadd.f32 %v1502_v12, %v1435_v57  ;;  %v1523_v12 = vld [vmem:[%s2476_s19 + $0xe8] sm:$0xff] }
 0x18d   : > { %1566 = vst [vmem:[%s3359_s22 + $0x40] sm:$0xff] %v1534_v13 }
 0x190   : > { %v1436_v37 = vpop.f32.mrf.mxu1 }
 0x191   : > { %v1437_v43 = vadd.f32 %v3343_v53, %v1436_v37 }
 0x193   : > { %v1535_v8 = vadd.f32 %v1503_v14, %v1437_v43  ;;  %v1499_v43 = vld [vmem:[%s2476_s19 + $0x28] sm:$0xff] }
 0x195   : > { %1567 = vst [vmem:[%s3359_s22 + $0x48] sm:$0xff] %v1535_v8 }
 0x19d   : > { %v1419_v17 = vpop.f32.mrf.mxu0 }
 0x19e   : > { %v1420_v45 = vadd.f32 %v3343_v53, %v1419_v17 }
 0x1a0   : > { %v1528_v41 = vadd.f32 %v1496_v23, %v1420_v45  ;;  %v1524_v45 = vld [vmem:[%s2476_s19 + $0xf0] sm:$0xff] }
 0x1a1   : > { %v1459_v28 = vpop.f32.mrf.mxu2 }
 0x1a2   : > { %v1460_v59 = vadd.f32 %v3343_v53, %v1459_v28  ;;  %1560 = vst [vmem:[%s3359_s22 + $0x10] sm:$0xff] %v1528_v41  ;;  %v1516_v41 = vld [vmem:[%s2476_s19 + $0xb0] sm:$0xff] }
 0x1a4   : > { %v1544_v15 = vadd.f32 %v1512_v29, %v1460_v59 }
 0x1a5   : > { %v1421_v35 = vpop.f32.mrf.mxu0 }
 0x1a6   : > { %1576 = vst [vmem:[%s3359_s22 + $0x90] sm:$0xff] %v1544_v15  ;;  %v1422_v63 = vadd.f32 %v3343_v53, %v1421_v35 }
 0x1a7   : > { %v1479_v42 = vpop.f32.mrf.mxu3 }
 0x1a8   : > { %v1480_v36 = vadd.f32 %v3343_v53, %v1479_v42  ;;  %v1529_v4 = vadd.f32 %v1497_v58, %v1422_v63  ;;  %v1500_v42 = vld [vmem:[%s2476_s19 + $0x30] sm:$0xff]  ;;  %v1525_v63 = vld [vmem:[%s2476_s19 + $0xf8] sm:$0xff] }
 0x1a9   : > { %v1461_v33 = vpop.f32.mrf.mxu2 }
 0x1aa   : > { %v1462_v26 = vadd.f32 %v3343_v53, %v1461_v33  ;;  %v1552_v47 = vadd.f32 %v1520_v49, %v1480_v36  ;;  %1561 = vst [vmem:[%s3359_s22 + $0x18] sm:$0xff] %v1529_v4 }
 0x1ac   : > { %v1545_v11 = vadd.f32 %v1513_v40, %v1462_v26  ;;  %1584 = vst [vmem:[%s3359_s22 + $0xd0] sm:$0xff] %v1552_v47  ;;  %v1517_v26 = vld [vmem:[%s2476_s19 + $0xb8] sm:$0xff] }
 0x1ae   : > { %1577 = vst [vmem:[%s3359_s22 + $0x98] sm:$0xff] %v1545_v11 }
 0x1af   : > { %v1481_v24 = vpop.f32.mrf.mxu3 }
 0x1b0   : > { %v1482_v48 = vadd.f32 %v3343_v53, %v1481_v24 }
 0x1b2   : > { %v1553_v30 = vadd.f32 %v1521_v55, %v1482_v48  ;;  %v1508_v48 = vld [vmem:[%s2476_s19 + $0x70] sm:$0xff] }
 0x1b4   : > { %1585 = vst [vmem:[%s3359_s22 + $0xd8] sm:$0xff] %v1553_v30 }
 0x1b5   : > { %v1439_v62 = vpop.f32.mrf.mxu1 }
 0x1b6   : > { %v1440_v18 = vadd.f32 %v3343_v53, %v1439_v62  ;;  %v1501_v62 = vld [vmem:[%s2476_s19 + $0x38] sm:$0xff] }
 0x1b8   : > { %v1536_v22 = vadd.f32 %v1504_v20, %v1440_v18 }
 0x1ba   : > { %1568 = vst [vmem:[%s3359_s22 + $0x50] sm:$0xff] %v1536_v22 }
 0x1bd   : > { %v1441_v6 = vpop.f32.mrf.mxu1 }
 0x1be   : > { %v1442_v16 = vadd.f32 %v3343_v53, %v1441_v6 }
 0x1c0   : > { %v1537_v27 = vadd.f32 %v1505_v0, %v1442_v16  ;;  %v1509_v16 = vld [vmem:[%s2476_s19 + $0x78] sm:$0xff] }
 0x1c2   : > { %1569 = vst [vmem:[%s3359_s22 + $0x58] sm:$0xff] %v1537_v27 }
 0x1c9   : > { %v1464_v54 = vpop.f32.mrf.mxu2 }
 0x1ca   : > { %v1465_v10 = vadd.f32 %v3343_v53, %v1464_v54 }
 0x1cc   : > { %v1546_v60 = vadd.f32 %v1514_v34, %v1465_v10 }
 0x1cd   : > { %v1444_v25 = vpop.f32.mrf.mxu1 }
 0x1ce   : > { %1578 = vst [vmem:[%s3359_s22 + $0xa0] sm:$0xff] %v1546_v60  ;;  %v1445_v46 = vadd.f32 %v3343_v53, %v1444_v25 }
 0x1cf   : > { %v1484_v7 = vpop.f32.mrf.mxu3 }
 0x1d0   : > { %v1538_v2 = vadd.f32 %v1506_v3, %v1445_v46  ;;  %v1485_v19 = vadd.f32 %v3343_v53, %v1484_v7 }
 0x1d1   : > { %v1466_v9 = vpop.f32.mrf.mxu2 }
 0x1d2   : > { %v1467_v51 = vadd.f32 %v3343_v53, %v1466_v9  ;;  %1570 = vst [vmem:[%s3359_s22 + $0x60] sm:$0xff] %v1538_v2  ;;  %v1554_v32 = vadd.f32 %v1522_v44, %v1485_v19  ;;  %v1424_v1 = vpop.f32.mrf.mxu0 }
 0x1d3   : > { %v1425_v61 = vadd.f32 %v3343_v53, %v1424_v1 }
 0x1d4   : > { %v1547_v38 = vadd.f32 %v1515_v5, %v1467_v51  ;;  %1586 = vst [vmem:[%s3359_s22 + $0xe0] sm:$0xff] %v1554_v32 }
 0x1d5   : > { %v1446_v21 = vpop.f32.mrf.mxu1  ;;  %v1530_v39 = vadd.f32 %v1498_v31, %v1425_v61 }
 0x1d6   : > { %1579 = vst [vmem:[%s3359_s22 + $0xa8] sm:$0xff] %v1547_v38  ;;  %v1447_v50 = vadd.f32 %v3343_v53, %v1446_v21 }
 0x1d7   : > { %1562 = vst [vmem:[%s3359_s22 + $0x20] sm:$0xff] %v1530_v39  ;;  %v1486_v52 = vpop.f32.mrf.mxu3 }
 0x1d8   : > { %v1539_v57 = vadd.f32 %v1507_v56, %v1447_v50  ;;  %v1487_v13 = vadd.f32 %v3343_v53, %v1486_v52 }
 0x1da   : > { %1571 = vst [vmem:[%s3359_s22 + $0x68] sm:$0xff] %v1539_v57  ;;  %v1555_v37 = vadd.f32 %v1523_v12, %v1487_v13  ;;  %v1426_v14 = vpop.f32.mrf.mxu0 }
 0x1db   : > { %v1427_v8 = vadd.f32 %v3343_v53, %v1426_v14 }
 0x1dc   : > { %1587 = vst [vmem:[%s3359_s22 + $0xe8] sm:$0xff] %v1555_v37 }
 0x1dd   : > { %v1531_v17 = vadd.f32 %v1499_v43, %v1427_v8 }
 0x1df   : > { %1563 = vst [vmem:[%s3359_s22 + $0x28] sm:$0xff] %v1531_v17 }
 0x1f0   : > { %v1489_v23 = vpop.f32.mrf.mxu3 }
 0x1f1   : > { %v1490_v28 = vadd.f32 %v3343_v53, %v1489_v23 }
 0x1f2   : > { %v1469_v29 = vpop.f32.mrf.mxu2 }
 0x1f3   : > { %v1556_v59 = vadd.f32 %v1524_v45, %v1490_v28  ;;  %v1470_v15 = vadd.f32 %v3343_v53, %v1469_v29 }
 0x1f5   : > { %1588 = vst [vmem:[%s3359_s22 + $0xf0] sm:$0xff] %v1556_v59  ;;  %v1548_v35 = vadd.f32 %v1516_v41, %v1470_v15 }
 0x1f7   : > { %1580 = vst [vmem:[%s3359_s22 + $0xb0] sm:$0xff] %v1548_v35  ;;  %v1429_v58 = vpop.f32.mrf.mxu0 }
 0x1f8   : > { %v1491_v49 = vpop.f32.mrf.mxu3  ;;  %v1430_v36 = vadd.f32 %v3343_v53, %v1429_v58 }
 0x1f9   : > { %v1492_v33 = vadd.f32 %v3343_v53, %v1491_v49 }
 0x1fa   : > { %v1532_v40 = vadd.f32 %v1500_v42, %v1430_v36  ;;  %v1471_v4 = vpop.f32.mrf.mxu2 }
 0x1fb   : > { %v1557_v47 = vadd.f32 %v1525_v63, %v1492_v33  ;;  %v1472_v11 = vadd.f32 %v3343_v53, %v1471_v4 }
 0x1fc   : > { %1564 = vst [vmem:[%s3359_s22 + $0x30] sm:$0xff] %v1532_v40 }
 0x1fd   : > { %v1549_v24 = vadd.f32 %v1517_v26, %v1472_v11  ;;  %1589 = vst [vmem:[%s3359_s22 + $0xf8] sm:$0xff] %v1557_v47 }
 0x1ff   : > { %1581 = vst [vmem:[%s3359_s22 + $0xb8] sm:$0xff] %v1549_v24  ;;  %v1431_v30 = vpop.f32.mrf.mxu0 }
 0x200   : > { %v1449_v55 = vpop.f32.mrf.mxu1  ;;  %v1432_v18 = vadd.f32 %v3343_v53, %v1431_v30 }
 0x201   : > { %v1450_v20 = vadd.f32 %v3343_v53, %v1449_v55 }
 0x202   : > { %v1533_v6 = vadd.f32 %v1501_v62, %v1432_v18 }
 0x203   : > { %v1540_v22 = vadd.f32 %v1508_v48, %v1450_v20 }
 0x204   : > { %1565 = vst [vmem:[%s3359_s22 + $0x38] sm:$0xff] %v1533_v6 }
 0x205   : > { %1572 = vst [vmem:[%s3359_s22 + $0x70] sm:$0xff] %v1540_v22 }
 0x208   : > { %v1451_v0 = vpop.f32.mrf.mxu1 }
 0x209   : > { %v1452_v27 = vadd.f32 %v3343_v53, %v1451_v0 }
 0x20b   : > { %v1541_v54 = vadd.f32 %v1509_v16, %v1452_v27 }
 0x20d   : > { %1573 = vst [vmem:[%s3359_s22 + $0x78] sm:$0xff] %v1541_v54 }
 0x20e   : > { %2283 = shalt.err (!%p2280_p0)
}
 0x20f   : > { %s2349_s6 = smov 128   ;;  %s2350_s19 = smov 8  }
 0x210   : > { %1979 = dma.vmem_to_hbm [thread:$0]  (%p2450_p5), %s1605_s25, 4096, %s1607_s26, %s1591_s15, %s2349_s6, %s2349_s6, %s2350_s19  }
 0x211 PF: > { %s1621_s1 = sand.u32 1, %s2322_s12   ;;  %p1990_p3 = pnand %p1719_p11, %p2420_p6 }
 0x212   : > { %s1622_s20 = scalar_lea.sflag [#allocation5], %s1621_s1 }
 0x213   : > { %p1991_p7 = pneg %p1990_p3 }
 0x215   : > { %2317 = dma.done.wait (%p1991_p7), %s1622_s20, 4096  }
 0x216   : > { %2319 = vsyncadd (%p1991_p7), %s1622_s20, 4294963200  ;;  %s20_s17 = sadd.s32 1, %s2342_s17   ;;  %s3506_s12 = smov %s2326_s13 }
 0x217   : > { %p17_p9 = scmp.ge.s32.totalorder %s20_s17, 4   ;;  %s3507_s13 = smov %s2330_s14 }
 0x218   : > { %s3508_s14 = smov %s2459_s18  ;;  %s3509_s15 = smov %s2338_s16 }
 0x219   : > { %s3510_s16 = smov %s3512_s5  ;;  %19 = sbr.rel (!%p17_p9) target bundleno = 9 (0x9), region = 89 }
 0x21e   :  { %1628 = vsyncpa [#allocation4], 1 }
 0x21f   :  { %1630 = vsyncpa [#allocation4 + $0x1], 1 }
 0x220   :  { %1631 = vsyncpa [#allocation7], 1 }
 0x221   :  { %1632 = vsyncpa [#allocation5], 1 }
 0x222   :  { %1634 = vsyncpa [#allocation5 + $0x1], 1 }

</bundles_post_ra>
